<compile_context>
chip_gen: v7x
topology: tpu7x:2x2x1
jax: 0.10.0
libtpu: 0.0.40
codegen_flags: <defaults>
</compile_context>

<pallas_src>
import functools

import jax
import jax.numpy as jnp
from jax.experimental import pallas as pl
from jax.experimental.pallas import tpu as pltpu


def _round_up(x, m):
    return ((x + m - 1) // m) * m


def _sigmoid(x):
    # exp -> EUP; exact division (review: keep KL inputs exact).
    return 1.0 / (1.0 + jnp.exp(-x))


# ---------------------------------------------------------------------------
# In-kernel im2col: build the (K_pad, tile_q) tap matrix from shifted slices.
# ---------------------------------------------------------------------------

def _build_taps(x_cur, x_halo, *, kh, kw, wpad, cin, tile_q, k_pad):
    """x_cur:(Cin,tile_q) lanes [q0,q0+tile_q); x_halo:(Cin,halo_pad) next lanes.

    Row order: tap (i,j) major / channel minor, then a ones row (bias), then
    zero rows padding K up to a multiple of 8 sublanes.
    """
    xcat = jnp.concatenate([x_cur, x_halo], axis=-1)          # (Cin, tile_q+halo_pad)
    chunks = []
    for i in range(kh):
        for j in range(kw):
            off = i * wpad + j                                # static lane shift
            chunks.append(xcat[:, off:off + tile_q])
    chunks.append(jnp.ones((1, tile_q), xcat.dtype))          # bias row (1^2 == 1)
    k_eff = kh * kw * cin + 1
    if k_pad > k_eff:
        chunks.append(jnp.zeros((k_pad - k_eff, tile_q), xcat.dtype))
    return jnp.concatenate(chunks, axis=0)                    # (K_pad, tile_q)


def _conv_kernel(x_cur_ref, x_halo_ref, w_ref, out_ref, *,
                 kh, kw, wpad, cin, tile_q, k_pad):
    """switch=False: out[:, tile] = W_packed @ taps  (bias folded)."""
    taps = _build_taps(x_cur_ref[...], x_halo_ref[...],
                       kh=kh, kw=kw, wpad=wpad, cin=cin,
                       tile_q=tile_q, k_pad=k_pad)
    out_ref[...] = jnp.dot(w_ref[...], taps,
                           preferred_element_type=jnp.float32).astype(out_ref.dtype)


def _bayes_kernel(x_cur_ref, x_halo_ref, wm_ref, ws_ref, noise_ref,
                  out_ref, kl_ref, *,
                  kh, kw, wpad, hp, h_img, w_img, cin, tile_q, k_pad, q_total):
    """switch=True:
         x_mean  = sigmoid(conv_mean(x))
         x_sigma = sigmoid(conv_sigma(x*x))        (taps squared in VMEM)
         out     = x_mean + sqrt(x_sigma) * noise
         kl      = sum over valid positions of (sigma + mean^2 - log sigma - 1)
    """
    taps = _build_taps(x_cur_ref[...], x_halo_ref[...],
                       kh=kh, kw=kw, wpad=wpad, cin=cin,
                       tile_q=tile_q, k_pad=k_pad)
    acc_m = jnp.dot(wm_ref[...], taps, preferred_element_type=jnp.float32)
    acc_s = jnp.dot(ws_ref[...], taps * taps, preferred_element_type=jnp.float32)
    x_mean = _sigmoid(acc_m)                                   # (Cout, tile_q) f32
    x_sigma = _sigmoid(acc_s)

    out_ref[...] = (x_mean + jnp.sqrt(x_sigma) * noise_ref[...]).astype(out_ref.dtype)

    # Validity mask for the wide-conv layout (garbage padding rows/cols and the
    # tail past q_total), computed in-kernel from the lane index (f32 math is
    # exact for these integer magnitudes).
    q0 = (pl.program_id(0) * tile_q).astype(jnp.float32)
    q = q0 + jax.lax.broadcasted_iota(jnp.int32, (1, tile_q), 1).astype(jnp.float32)
    rowg = jnp.floor((q + 0.5) / wpad)                          # global padded row
    col = q - rowg * wpad                                       # padded column
    rowi = rowg - jnp.floor((rowg + 0.5) / hp) * hp             # row within image
    valid = (col < (w_img - 0.5)) & (rowi < (h_img - 0.5)) & (q < (q_total - 0.5))
    mask = jnp.where(valid, 1.0, 0.0)

    x_sigma_safe = jnp.maximum(x_sigma, 1e-20)                  # keep log() finite
    kl_elem = (x_sigma + x_mean * x_mean - jnp.log(x_sigma_safe) - 1.0) * mask
    s = jnp.sum(kl_elem)                                        # scalar per grid step
    kl_ref[...] = jnp.broadcast_to(s * (1.0 / 128.0), (1, 128)).astype(kl_ref.dtype)


# ---------------------------------------------------------------------------
# Wrapper glue: tall-image layout, weight packing, VMEM-aware tiling.
# ---------------------------------------------------------------------------

def _pack_weights(w_oihw, b, k_pad, dtype):
    """(Cout,Cin,KH,KW),(Cout,) -> (Cout, K_pad): tap-major/channel-minor + bias col."""
    cout, cin, kh, kw = w_oihw.shape
    wt = jnp.transpose(w_oihw, (0, 2, 3, 1)).reshape(cout, kh * kw * cin)
    cols = [wt, b.reshape(cout, 1)]
    k_eff = kh * kw * cin + 1
    if k_pad > k_eff:
        cols.append(jnp.zeros((cout, k_pad - k_eff), wt.dtype))
    return jnp.concatenate(cols, axis=1).astype(dtype)


def _pick_tile_q(q_total, halo_pad, cin, cout, k_pad, in_bytes,
                 vmem_budget=12 * 1024 * 1024):
    """Largest lane tile (multiple of halo_pad, itself a 128 multiple) fitting a
    conservative VMEM budget that respects default scoped limits on v5e/v6e/v7x."""
    # Per-lane bytes: taps value + xcat + double-buffered input blocks (compute
    # dtype) + out/noise double-buffers + f32 intermediates.
    per_lane = in_bytes * (k_pad + 6 * cin) + 4 * 10 * cout
    tile = (vmem_budget // per_lane) // halo_pad * halo_pad
    tile = max(tile, halo_pad)
    tile = min(tile, max(8192 // halo_pad, 1) * halo_pad)       # cap per-step DMA
    tile = min(tile, _round_up(q_total, halo_pad))              # tiny problems: 1 tile
    return max(tile, halo_pad)


def _extract_valid(out_wide, n, cout, hp, wpad, h, w, q_total):
    o = out_wide[:, :q_total].reshape(cout, n, hp, wpad)[:, :, :h, :w]
    return jnp.transpose(o, (1, 0, 2, 3))                       # (N, Cout, H, W)


def bayesian_conv_forward(x, w_mean, b_mean, w_sigma, b_sigma, *,
                          switch=False, noise_key=None, noise=None,
                          compute_dtype=None):
    n, cin, h, w_sp = x.shape
    cout, cin2, kh, kw = w_mean.shape
    assert cin2 == cin and kh % 2 == 1 and kw % 2 == 1, "odd kernels, matching Cin"
    ph, pw = (kh - 1) // 2, (kw - 1) // 2
    hp, wpad = h + 2 * ph, w_sp + 2 * pw
    out_dtype = x.dtype
    cdt = compute_dtype if compute_dtype is not None else x.dtype

    k_eff = kh * kw * cin + 1                                   # taps + bias row
    k_pad = _round_up(k_eff, 8)
    halo = (kh - 1) * wpad + (kw - 1)
    halo_pad = _round_up(max(halo, 1), 128)

    q_total = n * hp * wpad                                     # batch folded into lanes
    tile_q = _pick_tile_q(q_total, halo_pad, cin, cout, k_pad,
                          jnp.dtype(cdt).itemsize)
    q_pad = _round_up(q_total, tile_q)
    num_tiles = q_pad // tile_q
    l_in = q_pad + tile_q                                       # room for the last halo

    # Pad spatially, stack batches into one tall image, flatten H*W into lanes.
    xp = jnp.pad(x, ((0, 0), (0, 0), (ph, ph), (pw, pw)))       # (N,Cin,Hp,Wpad)
    x_flat = jnp.transpose(xp, (1, 0, 2, 3)).reshape(cin, q_total)
    x_flat = jnp.pad(x_flat, ((0, 0), (0, l_in - q_total))).astype(cdt)

    wm = _pack_weights(w_mean, b_mean, k_pad, cdt)

    ratio = tile_q // halo_pad
    x_cur_spec = pl.BlockSpec((cin, tile_q), lambda j: (0, j))
    x_halo_spec = pl.BlockSpec((cin, halo_pad), lambda j: (0, (j + 1) * ratio))
    w_spec = pl.BlockSpec((cout, k_pad), lambda j: (0, 0))
    out_spec = pl.BlockSpec((cout, tile_q), lambda j: (0, j))

    cparams = pltpu.CompilerParams(
        dimension_semantics=("parallel",),
        vmem_limit_bytes=32 * 1024 * 1024)

    if not switch:
        kern = functools.partial(_conv_kernel, kh=kh, kw=kw, wpad=wpad,
                                 cin=cin, tile_q=tile_q, k_pad=k_pad)
        out_wide = pl.pallas_call(
            kern,
            out_shape=jax.ShapeDtypeStruct((cout, q_pad), out_dtype),
            grid_spec=pltpu.PrefetchScalarGridSpec(
                num_scalar_prefetch=0, grid=(num_tiles,),
                in_specs=[x_cur_spec, x_halo_spec, w_spec],
                out_specs=out_spec),
            compiler_params=cparams,
        )(x_flat, x_flat, wm)
        return _extract_valid(out_wide, n, cout, hp, wpad, h, w_sp, q_total), None

    ws = _pack_weights(w_sigma, b_sigma, k_pad, cdt)

    if noise is not None:
        # Caller-provided iid N(0,1) in (N, Cout, H, W); embed into wide layout.
        nt = jnp.transpose(noise, (1, 0, 2, 3))                 # (Cout,N,H,W)
        nt = jnp.pad(nt, ((0, 0), (0, 0), (0, hp - h), (0, wpad - w_sp)))
        noise_wide = jnp.pad(nt.reshape(cout, q_total),
                             ((0, 0), (0, q_pad - q_total))).astype(jnp.float32)
    else:
        if noise_key is None:
            noise_key = jax.random.PRNGKey(0)
        noise_wide = jax.random.normal(noise_key, (cout, q_pad), jnp.float32)

    noise_spec = pl.BlockSpec((cout, tile_q), lambda j: (0, j))
    kl_spec = pl.BlockSpec((1, 128), lambda j: (0, j))          # 1 scalar / step

    kern = functools.partial(_bayes_kernel, kh=kh, kw=kw, wpad=wpad, hp=hp,
                             h_img=h, w_img=w_sp, cin=cin, tile_q=tile_q,
                             k_pad=k_pad, q_total=q_total)
    out_wide, kl_parts = pl.pallas_call(
        kern,
        out_shape=(jax.ShapeDtypeStruct((cout, q_pad), out_dtype),
                   jax.ShapeDtypeStruct((1, num_tiles * 128), jnp.float32)),
        grid_spec=pltpu.PrefetchScalarGridSpec(
            num_scalar_prefetch=0, grid=(num_tiles,),
            in_specs=[x_cur_spec, x_halo_spec, w_spec, w_spec, noise_spec],
            out_specs=[out_spec, kl_spec]),
        compiler_params=cparams,
    )(x_flat, x_flat, wm, ws, noise_wide)

    out = _extract_valid(out_wide, n, cout, hp, wpad, h, w_sp, q_total)
    kl_loss = jnp.sum(kl_parts) / (n * cout * h * w_sp)
    return out, kl_loss


if __name__ == "__main__":
    key = jax.random.PRNGKey(0)
    kx, kwm, kbm, kws, kbs, kn = jax.random.split(key, 6)

    # params = {'num_channels': 4, 'num_filters': 8, 'kernel_h': 5,
    #           'kernel_w': 5, 'stride_conv': 1}
    N, Cin, H, W = 2, 4, 16, 16
    Cout, KH, KW = 8, 5, 5

    x = jax.random.normal(kx, (N, Cin, H, W), dtype=jnp.float32)
    fan_in = Cin * KH * KW
    bound = 1.0 / (fan_in ** 0.5)
    w_mean = jax.random.uniform(kwm, (Cout, Cin, KH, KW), jnp.float32, -bound, bound)
    b_mean = jax.random.uniform(kbm, (Cout,), jnp.float32, -bound, bound)
    w_sigma = jax.random.uniform(kws, (Cout, Cin, KH, KW), jnp.float32, -bound, bound)
    b_sigma = jax.random.uniform(kbs, (Cout,), jnp.float32, -bound, bound)

    def xla_conv(inp, wgt, bias):
        return jax.lax.conv_general_dilated(
            inp, wgt, window_strides=(1, 1),
            padding=(((KH - 1) // 2,) * 2, ((KW - 1) // 2,) * 2),
            dimension_numbers=("NCHW", "OIHW", "NCHW")) + bias.reshape(1, -1, 1, 1)

    # switch=False: plain conv_mean(input), kl is None (f32 compute).
    xm, kl_none = bayesian_conv_forward(x, w_mean, b_mean, w_sigma, b_sigma,
                                        switch=False)
    ref = xla_conv(x, w_mean, b_mean)
    assert kl_none is None
    assert xm.shape == (N, Cout, H, W)
    assert jnp.allclose(xm, ref, atol=1e-4, rtol=1e-4), "f32 conv mismatch"

    # Bandwidth-optimized bf16 taps/weights, f32 MXU accumulation (v6e/v7x).
    xm_bf16, _ = bayesian_conv_forward(x, w_mean, b_mean, w_sigma, b_sigma,
                                       switch=False, compute_dtype=jnp.bfloat16)
    assert jnp.allclose(xm_bf16, ref, atol=1e-1, rtol=1e-1), "bf16 conv mismatch"

    # switch=True: pass explicit iid N(0,1) so the sampled output is checkable.
    noise = jax.random.normal(kn, (N, Cout, H, W), dtype=jnp.float32)
    out, kl = bayesian_conv_forward(x, w_mean, b_mean, w_sigma, b_sigma,
                                    switch=True, noise=noise)
    jax.block_until_ready((xm, xm_bf16, out, kl))
    assert out.shape == (N, Cout, H, W)
    assert kl.shape == ()
    assert bool(jnp.isfinite(kl))

    m_ref = jax.nn.sigmoid(xla_conv(x, w_mean, b_mean))
    s_ref = jax.nn.sigmoid(xla_conv(x * x, w_sigma, b_sigma))
    out_ref = m_ref + jnp.sqrt(s_ref) * noise
    kl_ref = jnp.mean(s_ref + m_ref ** 2 - jnp.log(s_ref) - 1.0)
    assert jnp.allclose(out, out_ref, atol=5e-3, rtol=5e-3), "sampled output mismatch"
    assert jnp.allclose(kl, kl_ref, atol=5e-3, rtol=5e-3), "KL mismatch"

    print("KERNEL_OK")
</pallas_src>

<mosaic_0001>
module attributes {stable_mosaic.version = 11 : i64} {
  func.func @_conv_kernel(%arg0: i32, %arg1: memref<4x896xf32, #tpu.memory_space<vmem>>, %arg2: memref<4x128xf32, #tpu.memory_space<vmem>>, %arg3: memref<8x104xf32, #tpu.memory_space<vmem>>, %arg4: memref<8x896xf32, #tpu.memory_space<vmem>>) attributes {dimension_semantics = [#tpu.dimension_semantics<parallel>], iteration_bounds = array<i64: 1>, scalar_prefetch = 0 : i64, scratch_operands = 0 : i64, tpu.core_type = #tpu.core_type<tc>, window_params = [{transform_indices = @transform_0, window_bounds = array<i64: 4, 896>}, {transform_indices = @transform_1, window_bounds = array<i64: 4, 128>}, {pipeline_mode = #tpu.pipeline_mode<synchronous>, transform_indices = @transform_2, window_bounds = array<i64: 8, 104>}, {transform_indices = @transform_3, window_bounds = array<i64: 8, 896>}]} {
    %c0 = arith.constant 0 : index
    %c0_0 = arith.constant 0 : index
    %0 = vector.load %arg1[%c0, %c0_0] : memref<4x896xf32, #tpu.memory_space<vmem>>, vector<4x896xf32>
    %c0_1 = arith.constant 0 : index
    %c0_2 = arith.constant 0 : index
    %1 = vector.load %arg2[%c0_1, %c0_2] : memref<4x128xf32, #tpu.memory_space<vmem>>, vector<4x128xf32>
    %2 = tpu.concatenate %0, %1 in 1 : vector<4x896xf32>, vector<4x128xf32> -> vector<4x1024xf32>
    %3 = vector.extract_strided_slice %2 {offsets = [0, 0], sizes = [4, 896], strides = [1, 1]} : vector<4x1024xf32> to vector<4x896xf32>
    %4 = vector.extract_strided_slice %2 {offsets = [0, 1], sizes = [4, 896], strides = [1, 1]} : vector<4x1024xf32> to vector<4x896xf32>
    %5 = vector.extract_strided_slice %2 {offsets = [0, 2], sizes = [4, 896], strides = [1, 1]} : vector<4x1024xf32> to vector<4x896xf32>
    %6 = vector.extract_strided_slice %2 {offsets = [0, 3], sizes = [4, 896], strides = [1, 1]} : vector<4x1024xf32> to vector<4x896xf32>
    %7 = vector.extract_strided_slice %2 {offsets = [0, 4], sizes = [4, 896], strides = [1, 1]} : vector<4x1024xf32> to vector<4x896xf32>
    %8 = vector.extract_strided_slice %2 {offsets = [0, 20], sizes = [4, 896], strides = [1, 1]} : vector<4x1024xf32> to vector<4x896xf32>
    %9 = vector.extract_strided_slice %2 {offsets = [0, 21], sizes = [4, 896], strides = [1, 1]} : vector<4x1024xf32> to vector<4x896xf32>
    %10 = vector.extract_strided_slice %2 {offsets = [0, 22], sizes = [4, 896], strides = [1, 1]} : vector<4x1024xf32> to vector<4x896xf32>
    %11 = vector.extract_strided_slice %2 {offsets = [0, 23], sizes = [4, 896], strides = [1, 1]} : vector<4x1024xf32> to vector<4x896xf32>
    %12 = vector.extract_strided_slice %2 {offsets = [0, 24], sizes = [4, 896], strides = [1, 1]} : vector<4x1024xf32> to vector<4x896xf32>
    %13 = vector.extract_strided_slice %2 {offsets = [0, 40], sizes = [4, 896], strides = [1, 1]} : vector<4x1024xf32> to vector<4x896xf32>
    %14 = vector.extract_strided_slice %2 {offsets = [0, 41], sizes = [4, 896], strides = [1, 1]} : vector<4x1024xf32> to vector<4x896xf32>
    %15 = vector.extract_strided_slice %2 {offsets = [0, 42], sizes = [4, 896], strides = [1, 1]} : vector<4x1024xf32> to vector<4x896xf32>
    %16 = vector.extract_strided_slice %2 {offsets = [0, 43], sizes = [4, 896], strides = [1, 1]} : vector<4x1024xf32> to vector<4x896xf32>
    %17 = vector.extract_strided_slice %2 {offsets = [0, 44], sizes = [4, 896], strides = [1, 1]} : vector<4x1024xf32> to vector<4x896xf32>
    %18 = vector.extract_strided_slice %2 {offsets = [0, 60], sizes = [4, 896], strides = [1, 1]} : vector<4x1024xf32> to vector<4x896xf32>
    %19 = vector.extract_strided_slice %2 {offsets = [0, 61], sizes = [4, 896], strides = [1, 1]} : vector<4x1024xf32> to vector<4x896xf32>
    %20 = vector.extract_strided_slice %2 {offsets = [0, 62], sizes = [4, 896], strides = [1, 1]} : vector<4x1024xf32> to vector<4x896xf32>
    %21 = vector.extract_strided_slice %2 {offsets = [0, 63], sizes = [4, 896], strides = [1, 1]} : vector<4x1024xf32> to vector<4x896xf32>
    %22 = vector.extract_strided_slice %2 {offsets = [0, 64], sizes = [4, 896], strides = [1, 1]} : vector<4x1024xf32> to vector<4x896xf32>
    %23 = vector.extract_strided_slice %2 {offsets = [0, 80], sizes = [4, 896], strides = [1, 1]} : vector<4x1024xf32> to vector<4x896xf32>
    %24 = vector.extract_strided_slice %2 {offsets = [0, 81], sizes = [4, 896], strides = [1, 1]} : vector<4x1024xf32> to vector<4x896xf32>
    %25 = vector.extract_strided_slice %2 {offsets = [0, 82], sizes = [4, 896], strides = [1, 1]} : vector<4x1024xf32> to vector<4x896xf32>
    %26 = vector.extract_strided_slice %2 {offsets = [0, 83], sizes = [4, 896], strides = [1, 1]} : vector<4x1024xf32> to vector<4x896xf32>
    %27 = vector.extract_strided_slice %2 {offsets = [0, 84], sizes = [4, 896], strides = [1, 1]} : vector<4x1024xf32> to vector<4x896xf32>
    %cst = arith.constant 1.000000e+00 : f32
    %28 = vector.broadcast %cst : f32 to vector<1x896xf32>
    %cst_3 = arith.constant 0.000000e+00 : f32
    %29 = vector.broadcast %cst_3 : f32 to vector<3x896xf32>
    %30 = tpu.concatenate %3, %4, %5, %6, %7, %8, %9, %10, %11, %12, %13, %14, %15, %16, %17, %18 in 0 : vector<4x896xf32>, vector<4x896xf32>, vector<4x896xf32>, vector<4x896xf32>, vector<4x896xf32>, vector<4x896xf32>, vector<4x896xf32>, vector<4x896xf32>, vector<4x896xf32>, vector<4x896xf32>, vector<4x896xf32>, vector<4x896xf32>, vector<4x896xf32>, vector<4x896xf32>, vector<4x896xf32>, vector<4x896xf32> -> vector<64x896xf32>
    %31 = tpu.concatenate %19, %20, %21, %22, %23, %24, %25, %26, %27, %28, %29 in 0 : vector<4x896xf32>, vector<4x896xf32>, vector<4x896xf32>, vector<4x896xf32>, vector<4x896xf32>, vector<4x896xf32>, vector<4x896xf32>, vector<4x896xf32>, vector<4x896xf32>, vector<1x896xf32>, vector<3x896xf32> -> vector<40x896xf32>
    %32 = tpu.concatenate %30, %31 in 0 : vector<64x896xf32>, vector<40x896xf32> -> vector<104x896xf32>
    %c0_4 = arith.constant 0 : index
    %c0_5 = arith.constant 0 : index
    %33 = vector.load %arg3[%c0_4, %c0_5] : memref<8x104xf32, #tpu.memory_space<vmem>>, vector<8x104xf32>
    %cst_6 = arith.constant dense<0.000000e+00> : vector<8x896xf32>
    %34 = tpu.matmul %33, %32, %cst_6 {dimension_numbers = #tpu.dot_dimension_numbers<[1], [0], [0], [1], [0, 0, 1, 1], [], []>} : vector<8x104xf32>, vector<104x896xf32>, vector<8x896xf32> -> vector<8x896xf32>
    %c0_7 = arith.constant 0 : index
    %c0_8 = arith.constant 0 : index
    %35 = vector.load %arg4[%c0_7, %c0_8] : memref<8x896xf32, #tpu.memory_space<vmem>>, vector<8x896xf32>
    tpu.vector_store %arg4[%c0_7, %c0_8], %34 {strides = array<i32>} : memref<8x896xf32, #tpu.memory_space<vmem>>, vector<8x896xf32>,
    return
  }
  func.func @transform_0(%arg0: i32) -> (i32, i32) {
    %c0_i32 = arith.constant 0 : i32
    %c0_i32_0 = arith.constant 0 : i32
    return %c0_i32, %arg0 : i32, i32
  }
  func.func @transform_1(%arg0: i32) -> (i32, i32) {
    %c1_i32 = arith.constant 1 : i32
    %0 = arith.addi %arg0, %c1_i32 : i32
    %c7_i32 = arith.constant 7 : i32
    %1 = arith.muli %0, %c7_i32 : i32
    %c0_i32 = arith.constant 0 : i32
    %c0_i32_0 = arith.constant 0 : i32
    return %c0_i32, %1 : i32, i32
  }
  func.func @transform_2(%arg0: i32) -> (i32, i32) {
    %c0_i32 = arith.constant 0 : i32
    %c0_i32_0 = arith.constant 0 : i32
    %c0_i32_1 = arith.constant 0 : i32
    return %c0_i32, %c0_i32_0 : i32, i32
  }
  func.func @transform_3(%arg0: i32) -> (i32, i32) {
    %c0_i32 = arith.constant 0 : i32
    %c0_i32_0 = arith.constant 0 : i32
    return %c0_i32, %arg0 : i32, i32
  }
}

</mosaic_0001>

<bundles_post_ra>
// kernel: tpu_custom_call.1
= control target key start
LH: loop header
LB: loop body
LE: loop exit
PB: predicated region body
PF: predicated region fallthrough
CT: control target
= control target key end

     0   :  { %8 = vsyncpa [#allocation3], 0  ;;  %s2746_s0 = inlined_call_operand.hbm [shape: f32[4,1792], index: 0, kind: input, shape index: {}]   ;;  %s2747_s1 = inlined_call_operand.hbm [shape: f32[4,1792], index: 1, kind: input, shape index: {}]   ;;  %s2748_s2 = inlined_call_operand.hbm [shape: f32[8,104], index: 2, kind: input, shape index: {}]   ;;  %s2749_s3 = inlined_call_operand.hbm [shape: f32[8,896], index: 3, kind: output, shape index: {}]  }
   0x1   :  { %9 = vsyncpa [#allocation6], 0  ;;  %s1170_s14 = scalar_lea.hbm %s2747_s1, 448 }
   0x2   :  { %10 = vsyncpa [#allocation4], 0  ;;  %s1807_s15 = smov [#allocation5]   ;;  %s1808_s17 = smov [#allocation2]  }
   0x3   :  { %s31_s16 = sshll.u32 %s1807_s15, 4  ;;  %s17_s18 = sshll.u32 %s1808_s17, 4  ;;  %s32_s16 = int_to_ptr.vmem [resolvable:$true] %s31_s16  ;;  %s18_s18 = int_to_ptr.vmem [resolvable:$true] %s17_s18 }
   0x4   :  { %s1734_s21 = scalar_lea.hbm %s2747_s1, 512  ;;  %s1712_s24 = scalar_lea.hbm %s2747_s1, 896 }
   0x5   :  { %p1711_p0 = scmp.ne.s32.totalorder %s1170_s14, %s1734_s21  ;;  %p1713_p1 = scmp.lt.u32.totalorder %s1170_s14, %s2747_s1 }
   0x6   :  { %p1714_p2 = scmp.lt.u32.totalorder %s1712_s24, %s1734_s21  ;;  %p1716_p4 = scmp.lt.u32.totalorder %s1734_s21, %s1170_s14 }
   0x8   :  { %p1715_p3 = por %p1714_p2, %p1713_p1 }
   0xa   :  { %p1717_p5 = por %p1716_p4, %p1715_p3 }
   0xc   :  { %p1718_p6 = pnand %p1717_p5, %p1711_p0 }
   0xe   :  { %1721 = shalt.err (!%p1718_p6)
}
   0xf   :  { %s1722_s27 = scalar_lea.vmem %s32_s16, 64  ;;  %p1727_p8 = scmp.lt.s32.totalorder %s32_s16, %s32_s16 }
  0x10   :  { %p1723_p7 = scmp.ne.s32.totalorder %s32_s16, %s1722_s27  ;;  %p1728_p9 = scmp.lt.s32.totalorder %s1722_s27, %s1722_s27 }
  0x12   :  { %p1729_p10 = por %p1728_p9, %p1727_p8 }
  0x14   :  { %p1730_p11 = pnand %p1729_p10, %p1723_p7 }
  0x16   :  { %1733 = shalt.err (!%p1730_p11)
}
  0x17   :  { %34 = dma.hbm_to_vmem [thread:$0]  %s1170_s14, 64, %s32_s16, [#allocation6]  }
  0x18   :  { %s1735_s30 = scalar_lea.hbm %s2746_s0, 448  ;;  %s1737_s7 = scalar_lea.hbm %s2746_s0, 896 }
  0x19   :  { %p1736_p12 = scmp.ne.s32.totalorder %s2746_s0, %s1735_s30  ;;  %p1738_p13 = scmp.lt.u32.totalorder %s1737_s7, %s1735_s30 }
  0x1a   :  { %p1739_p0 = scmp.lt.u32.totalorder %s1735_s30, %s2746_s0 }
  0x1c   :  { %p1740_p1 = por %p1739_p0, %p1738_p13 }
  0x1e   :  { %p1741_p2 = pnand %p1740_p1, %p1736_p12 }
  0x20   :  { %1744 = shalt.err (!%p1741_p2)
}
  0x21   :  { %s1745_s10 = scalar_lea.vmem %s18_s18, 448  ;;  %p1750_p4 = scmp.lt.s32.totalorder %s18_s18, %s18_s18 }
  0x22   :  { %p1746_p3 = scmp.ne.s32.totalorder %s18_s18, %s1745_s10  ;;  %p1751_p5 = scmp.lt.s32.totalorder %s1745_s10, %s1745_s10 }
  0x24   :  { %p1752_p6 = por %p1751_p5, %p1750_p4 }
  0x26   :  { %p1753_p7 = pnand %p1752_p6, %p1746_p3 }
  0x28   :  { %1756 = shalt.err (!%p1753_p7)
}
  0x29   :  { %20 = dma.hbm_to_vmem [thread:$0]  %s2746_s0, 448, %s18_s18, [#allocation3]  }
  0x2a   :  { %s1809_s13 = smov [#allocation7]   ;;  %s1757_s17 = scalar_lea.hbm %s2748_s2, 128 }
  0x2b   :  { %s41_s14 = sshll.u32 %s1809_s13, 4  ;;  %p1758_p8 = scmp.ne.s32.totalorder %s2748_s2, %s1757_s17  ;;  %s42_s14 = int_to_ptr.vmem [resolvable:$true] %s41_s14 }
  0x2c   :  { %p1761_p9 = scmp.lt.u32.totalorder %s1757_s17, %s2748_s2 }
  0x2e   :  { %p1763_p10 = pnand %p1761_p9, %p1758_p8 }
  0x30   :  { %1766 = shalt.err (!%p1763_p10)
}
  0x31   :  { %s1767_s23 = scalar_lea.vmem %s42_s14, 128  ;;  %p1772_p12 = scmp.lt.s32.totalorder %s42_s14, %s42_s14 }
  0x32   :  { %p1768_p11 = scmp.ne.s32.totalorder %s42_s14, %s1767_s23  ;;  %p1773_p13 = scmp.lt.s32.totalorder %s1767_s23, %s1767_s23 }
  0x34   :  { %p1774_p0 = por %p1773_p13, %p1772_p12 }
  0x36   :  { %p1775_p1 = pnand %p1774_p0, %p1768_p11 }
  0x38   :  { %1778 = shalt.err (!%p1775_p1)
}
  0x39   :  { %44 = dma.hbm_to_vmem [thread:$0]  %s2748_s2, 128, %s42_s14, [#allocation6]  }
  0x3a   :  { %1801 = dma.done.wait [#allocation3], 448  }
  0x3b   :  { %1802 = vsyncadd [#allocation3], 4294966848 }
  0x3c   :  { %1803 = dma.done.wait [#allocation6], 192  }
  0x3d   :  { %1804 = vsyncadd [#allocation6], 4294967104  ;;  %v1890_v0 = vld [vmem:[#allocation2] sm:$0xff]  ;;  %v1892_v1 = vld [vmem:[#allocation2 + $0x8] sm:$0xff]  ;;  %s1810_s2 = smov 126   ;;  %s1811_s24 = smov 127  }
  0x3e   :  { %v1896_v2 = vcombine.high %v1890_v0, %v1890_v0  ;;  %v1900_v3 = vcombine.high %v1892_v1, %v1892_v1  ;;  %v74_v4 = vrot.slane %v1892_v1, 4  ;;  %v72_v5 = vrot.slane %v1890_v0, 4  ;;  %v1920_v10 = vld [vmem:[#allocation2 + $0x10] sm:$0xff]  ;;  %s1812_s25 = smov 125   ;;  %s1813_s26 = smov 108  }
  0x3f   :  { %v1926_v11 = vcombine.high %v1920_v10, %v1920_v10  ;;  %v76_v12 = vrot.slane %v1920_v10, 4  ;;  %s1814_s27 = smov 107   ;;  %s1815_s28 = smov 106   ;;  %v1965_v15 = vld [vmem:[#allocation2 + $0x18] sm:$0xf]  ;;  %vm96_vm0 = vcmask 1039360  }
  0x40   :  { %v1906_v6 = vpack.i.bf16 %v1892_v1, %v1896_v2  ;;  %v1909_v7 = vpack.i.bf16 %v74_v4, %v1896_v2  ;;  %v1347_v8 = vpack.i.bf16 %v1890_v0, %v1900_v3  ;;  %v1337_v9 = vpack.i.bf16 %v72_v5, %v1900_v3  ;;  %s1816_s29 = smov 109   ;;  %s1817_s30 = smov 105   ;;  %v1967_v16 = vld [vmem:[#allocation5] sm:$0xf] }
  0x41   :  { %v1934_v13 = vpack.i.bf16 %v1926_v11, %v1920_v10  ;;  %v1939_v14 = vpack.i.bf16 %v1926_v11, %v76_v12  ;;  %v78_v17 = vrot.slane %v1965_v15, 4  ;;  %v79_v18 = vrot.slane %v1967_v16, 4  ;;  %s1818_s1 = smov 124   ;;  %s1819_s4 = smov 104  }
  0x42   :  { %1343 = vrot.lane.b32.xlu1 %v1906_v6, %s1810_s2  ;;  %1333 = vrot.lane.b32.xlu0 %v1909_v7, %s1811_s24  ;;  %v1986_v20 = vpack.i.bf16 %v1967_v16, %v1965_v15  ;;  %v1477_v21 = vpack.i.bf16 %v1900_v3, %v1890_v0  ;;  %s1820_s5 = smov 87   ;;  %s1821_s6 = smov 88   ;;  %v1502_v22 = vpack.i.bf16 %v1900_v3, %v72_v5  ;;  %vm127_vm1 = vcmask 1031168  }
  0x43   :  { %v1979_v19 = vpack.i.bf16 %v79_v18, %v78_v17  ;;  %s1822_s7 = smov 86   ;;  %s1823_s8 = smov 85   ;;  %vm545_vm2 = vcmask 1043456   ;;  %vm158_vm3 = vcmask 1022976   ;;  %vm282_vm4 = vcmask 867328  }
  0x44   :  { %s1824_s9 = smov 84   ;;  %s1825_s10 = smov 68   ;;  %vm251_vm5 = vcmask 875520   ;;  %vm621_vm6 = vcmask 891904   ;;  %vm220_vm7 = vcmask 883712   ;;  %vm313_vm8 = vcmask 859136  }
  0x45   :  { %s1826_s11 = smov 67   ;;  %vm660_vm9 = vcmask 1044480   ;;  %vm189_vm10 = vcmask 1014784   ;;  %vm344_vm11 = vcmask 850944   ;;  %vm406_vm12 = vcmask 711680   ;;  %s1830_s12 = smov [#allocation8]  }
  0x46   :  { %1348 = vrot.lane.b32.xlu1 %v1347_v8, %s1810_s2  ;;  %1338 = vrot.lane.b32.xlu0 %v1337_v9, %s1811_s24  ;;  %vm375_vm13 = vcmask 719872   ;;  %vm437_vm14 = vcmask 703488   ;;  %vm468_vm15 = vcmask 695296   ;;  %s1160_s13 = sshll.u32 %s1830_s12, 4  ;;  %s1161_s13 = int_to_ptr.vmem [resolvable:$true] %s1160_s13 }
  0x47   :  { %s1779_s14 = scalar_lea.vmem %s1161_s13, 896  ;;  %p1784_p3 = scmp.lt.s32.totalorder %s1161_s13, %s1161_s13 }
  0x48   :  { %p1780_p2 = scmp.ne.s32.totalorder %s1161_s13, %s1779_s14  ;;  %p1785_p4 = scmp.lt.s32.totalorder %s1779_s14, %s1779_s14 }
  0x4a   :  { %1358 = vrot.lane.b32.xlu1 %v1337_v9, %s1812_s25  ;;  %1353 = vrot.lane.b32.xlu0 %v1909_v7, %s1812_s25  ;;  %p1786_p5 = por %p1785_p4, %p1784_p3 }
  0x4c   :  { %p1787_p6 = pnand %p1786_p5, %p1780_p2 }
  0x4e   :  { %1368 = vrot.lane.b32.xlu1 %v1934_v13, %s1810_s2  ;;  %1363 = vrot.lane.b32.xlu0 %v1939_v14, %s1811_s24 }
  0x52   :  { %1378 = vrot.lane.b32.xlu1 %v1909_v7, %s1813_s26  ;;  %1373 = vrot.lane.b32.xlu0 %v1939_v14, %s1812_s25 }
  0x56   :  { %1388 = vrot.lane.b32.xlu1 %v1906_v6, %s1814_s27  ;;  %1383 = vrot.lane.b32.xlu0 %v1337_v9, %s1813_s26 }
  0x5a   :  { %1398 = vrot.lane.b32.xlu1 %v1909_v7, %s1815_s28  ;;  %1393 = vrot.lane.b32.xlu0 %v1347_v8, %s1814_s27 }
  0x5e   :  { %1408 = vrot.lane.b32.xlu1 %v1906_v6, %s1816_s29  ;;  %1403 = vrot.lane.b32.xlu0 %v1337_v9, %s1815_s28 }
  0x62   :  { %1418 = vrot.lane.b32.xlu1 %v1939_v14, %s1813_s26  ;;  %1413 = vrot.lane.b32.xlu0 %v1347_v8, %s1816_s29 }
  0x66   :  { %1428 = vrot.lane.b32.xlu1 %v1939_v14, %s1815_s28  ;;  %1423 = vrot.lane.b32.xlu0 %v1934_v13, %s1814_s27 }
  0x6a   :  { %299 = vrot.lane.b32.xlu1 %v1896_v2, %s1817_s30  ;;  %1433 = vrot.lane.b32.xlu0 %v1934_v13, %s1816_s29 }
  0x6e   :  { %303 = vrot.lane.b32.xlu1 %v1900_v3, %s1817_s30  ;;  %301 = vrot.lane.b32.xlu0 %v1892_v1, %s1817_s30 }
  0x72   :  { %305 = vrot.lane.b32.xlu1 %v1920_v10, %s1817_s30  ;;  %297 = vrot.lane.b32.xlu0 %v1890_v0, %s1817_s30 }
  0x76   :  { %1438 = vrot.lane.b32.xlu1 %v1979_v19, %s1811_s24  ;;  %307 = vrot.lane.b32.xlu0 %v1926_v11, %s1817_s30 }
  0x7a   :  { %1448 = vrot.lane.b32.xlu1 %v1979_v19, %s1812_s25  ;;  %1443 = vrot.lane.b32.xlu0 %v1986_v20, %s1810_s2 }
  0x7e   :  { %1458 = vrot.lane.b32.xlu1 %v1986_v20, %s1814_s27  ;;  %1453 = vrot.lane.b32.xlu0 %v1979_v19, %s1813_s26 }
  0x82   :  { %1468 = vrot.lane.b32.xlu1 %v1986_v20, %s1816_s29  ;;  %1463 = vrot.lane.b32.xlu0 %v1979_v19, %s1815_s28 }
  0x86   :  { %311 = vrot.lane.b32.xlu1 %v1967_v16, %s1817_s30  ;;  %309 = vrot.lane.b32.xlu0 %v1965_v15, %s1817_s30 }
  0x8a   :  { %1478 = vrot.lane.b32.xlu1 %v1477_v21, %s1818_s1  ;;  %1473 = vrot.lane.b32.xlu0 %v1906_v6, %s1818_s1 }
  0x8e   :  { %1488 = vrot.lane.b32.xlu1 %v1909_v7, %s1819_s4  ;;  %1483 = vrot.lane.b32.xlu0 %v1934_v13, %s1818_s1 }
  0x92   :  { %1498 = vrot.lane.b32.xlu1 %v1909_v7, %s1820_s5  ;;  %1493 = vrot.lane.b32.xlu0 %v1906_v6, %s1821_s6 }
  0x96   :  { %1508 = vrot.lane.b32.xlu1 %v1939_v14, %s1819_s4  ;;  %1503 = vrot.lane.b32.xlu0 %v1502_v22, %s1819_s4 }
  0x9a   :  { %1518 = vrot.lane.b32.xlu1 %v1934_v13, %s1821_s6  ;;  %1513 = vrot.lane.b32.xlu0 %v1477_v21, %s1821_s6 }
  0x9e   :  { %1528 = vrot.lane.b32.xlu1 %v1939_v14, %s1820_s5  ;;  %1523 = vrot.lane.b32.xlu0 %v1502_v22, %s1820_s5 }
  0xa2   :  { %1533 = vrot.lane.b32.xlu0 %v1906_v6, %s1822_s7  ;;  %1538 = vrot.lane.b32.xlu1 %v1909_v7, %s1823_s8 }
  0xa6   :  { %1543 = vrot.lane.b32.xlu0 %v1906_v6, %s1824_s9  ;;  %1548 = vrot.lane.b32.xlu1 %v1909_v7, %s1825_s10 }
  0xaa   :  { %1553 = vrot.lane.b32.xlu0 %v1477_v21, %s1822_s7  ;;  %1558 = vrot.lane.b32.xlu1 %v1934_v13, %s1822_s7 }
  0xae   :  { %1563 = vrot.lane.b32.xlu0 %v1502_v22, %s1823_s8  ;;  %1568 = vrot.lane.b32.xlu1 %v1939_v14, %s1823_s8 }
  0xb2   :  { %1573 = vrot.lane.b32.xlu0 %v1477_v21, %s1824_s9  ;;  %1578 = vrot.lane.b32.xlu1 %v1934_v13, %s1824_s9 }
  0xb4   :  { %v1344_v23 = vpop.permute.xlu1 %1343  ;;  %v1334_v24 = vpop.permute.xlu0 %1333 }
  0xb5   :  { %v1336_v25 = vunpack.i.h.bf16 %v1334_v24  ;;  %v1335_v26 = vunpack.i.l.bf16 %v1334_v24  ;;  %v1346_v27 = vunpack.i.h.bf16 %v1344_v23  ;;  %v1345_v28 = vunpack.i.l.bf16 %v1344_v23 }
  0xb6   :  { %1583 = vrot.lane.b32.xlu0 %v1502_v22, %s1825_s10  ;;  %522 = vrot.lane.b32.xlu1 %v76_v12, %s1825_s10 }
  0xb7   :  { %v98_v31 = vsel %vm96_vm0, %v1335_v26, %v1336_v25  ;;  %v129_v36 = vsel %vm127_vm1, %v1345_v28, %v1346_v27 }
  0xb8   :  { %v1349_v29 = vpop.permute.xlu1 %1348  ;;  %v1339_v30 = vpop.permute.xlu0 %1338  ;;  %v547_v41 = vsel %vm545_vm2, %v1896_v2, %v98_v31 }
  0xb9   :  { %v1351_v32 = vunpack.i.h.bf16 %v1349_v29  ;;  %v1350_v33 = vunpack.i.l.bf16 %v1349_v29  ;;  %v1340_v34 = vunpack.i.l.bf16 %v1339_v30  ;;  %v1341_v35 = vunpack.i.h.bf16 %v1339_v30 }
  0xbb   :  { %v99_v37 = vsel %vm96_vm0, %v1336_v25, %v1340_v34  ;;  %v130_v38 = vsel %vm127_vm1, %v1346_v27, %v1350_v33  ;;  %v128_v43 = vsel %vm127_vm1, %v1351_v32, %v1345_v28  ;;  %v97_v49 = vsel %vm96_vm0, %v1341_v35, %v1335_v26 }
  0xbc   :  { %v1359_v39 = vpop.permute.xlu1 %1358  ;;  %v1354_v40 = vpop.permute.xlu0 %1353  ;;  %v548_v42 = vsel %vm545_vm2, %v1892_v1, %v99_v37  ;;  %v546_v61 = vsel %vm545_vm2, %v1890_v0, %v97_v49 }
  0xbd   :  { %v1361_v44 = vunpack.i.h.bf16 %v1359_v39  ;;  %v1360_v45 = vunpack.i.l.bf16 %v1359_v39  ;;  %v1356_v46 = vunpack.i.h.bf16 %v1354_v40  ;;  %v1355_v47 = vunpack.i.l.bf16 %v1354_v40 }
  0xbe   :  { %v1587_v48 = vpack.i.bf16 %v548_v42, %v547_v41 }
  0xbf   :  { %v161_v50 = vsel %vm158_vm3, %v1356_v46, %v1360_v45  ;;  %v160_v51 = vsel %vm158_vm3, %v1355_v47, %v1356_v46  ;;  %v159_v52 = vsel %vm158_vm3, %v1361_v44, %v1355_v47 }
  0xc0   :  { %1588 = vrot.lane.b32.xlu0 %v1587_v48, %s1826_s11  ;;  %v2061_v53 = vpop.permute.xlu1 %1368  ;;  %v2063_v54 = vpop.permute.xlu0 %1363  ;;  %v554_v55 = vsel %vm545_vm2, %v129_v36, %v160_v51  ;;  %v555_v56 = vsel %vm545_vm2, %v130_v38, %v161_v50  ;;  %v553_v57 = vsel %vm545_vm2, %v128_v43, %v159_v52 }
  0xc1   :  { %v1371_v58 = vunpack.i.h.bf16 %v2061_v53  ;;  %v1366_v59 = vunpack.i.h.bf16 %v2063_v54  ;;  %v1365_v60 = vunpack.i.l.bf16 %v2063_v54  ;;  %v1592_v62 = vpack.i.bf16 %v555_v56, %v554_v55 }
  0xc2   :  { %v1218_v63 = vpack.c.bf16 %v554_v55, %v547_v41  ;;  %v1220_v1 = vpack.c.bf16 %v553_v57, %v546_v61  ;;  %v1370_v2 = vunpack.i.l.bf16 %v2061_v53  ;;  %v1244_v30 = vpack.c.bf16 %v555_v56, %v548_v42 }
  0xc3   :  { %v100_v4 = vsel %vm96_vm0, %v1340_v34, %v1365_v60  ;;  %v101_v5 = vsel %vm96_vm0, %v1365_v60, %v1366_v59  ;;  %1593 = vrot.lane.b32.xlu1 %v1592_v62, %s1826_s11 }
  0xc4   :  { %1219 = vmatprep.subr.bf16.mxu0 %v1218_v63  ;;  %v2079_v6 = vpop.permute.xlu1 %1378  ;;  %v2081_v7 = vpop.permute.xlu0 %1373  ;;  %v2085_v0 = vsel %vm545_vm2, %v1920_v10, %v101_v5  ;;  %v549_v8 = vsel %vm545_vm2, %v1900_v3, %v100_v4  ;;  %v132_v13 = vsel %vm127_vm1, %v1370_v2, %v1371_v58  ;;  %v131_v22 = vsel %vm127_vm1, %v1350_v33, %v1370_v2 }
  0xc5   :  { %v1376_v9 = vunpack.i.h.bf16 %v2081_v7  ;;  %v1375_v12 = vunpack.i.l.bf16 %v2081_v7  ;;  %1221 = vmatpush1.bf16.msra.mxu0 %v1220_v1  ;;  %v1602_v14 = vpack.i.bf16 %v553_v57, %v2085_v0  ;;  %v1597_v21 = vpack.i.bf16 %v549_v8, %v546_v61 }
  0xc6   :  { %v1381_v43 = vunpack.i.h.bf16 %v2079_v6  ;;  %v1380_v56 = vunpack.i.l.bf16 %v2079_v6 }
  0xc7   :  { %v162_v10 = vsel %vm158_vm3, %v1360_v45, %v1375_v12  ;;  %v163_v3 = vsel %vm158_vm3, %v1375_v12, %v1376_v9  ;;  %1603 = vrot.lane.b32.xlu1 %v1602_v14, %s1826_s11  ;;  %1598 = vrot.lane.b32.xlu0 %v1597_v21, %s1826_s11 }
  0xc8   :  { %v2102_v23 = vpop.permute.xlu1 %1388  ;;  %v2104_v24 = vpop.permute.xlu0 %1383  ;;  %v556_v25 = vsel %vm545_vm2, %v131_v22, %v162_v10  ;;  %v2108_v26 = vsel %vm545_vm2, %v132_v13, %v163_v3  ;;  %v2142_v1 = vsel %vm220_vm7, %v1380_v56, %v1381_v43 }
  0xc9   :  { %v1607_v27 = vpack.i.bf16 %v2108_v26, %v556_v25  ;;  %v1242_v28 = vpack.c.bf16 %v556_v25, %v549_v8  ;;  %v1268_v29 = vpack.c.bf16 %v2108_v26, %v2085_v0  ;;  %v1391_v35 = vunpack.i.h.bf16 %v2102_v23 }
  0xca   :  { %v1390_v36 = vunpack.i.l.bf16 %v2102_v23  ;;  %v1385_v46 = vunpack.i.l.bf16 %v2104_v24  ;;  %v1386_v2 = vunpack.i.h.bf16 %v2104_v24 }
  0xcb   :  { %1243 = vmatprep.subr.bf16.mxu1 %v1242_v28  ;;  %1608 = vrot.lane.b32.xlu0 %v1607_v27, %s1826_s11 }
  0xcc   :  { %v1399_v31 = vpop.permute.xlu1 %1398  ;;  %v2114_v32 = vpop.permute.xlu0 %1393  ;;  %1245 = vmatpush1.bf16.msra.mxu1 %v1244_v30  ;;  %v253_v38 = vsel %vm251_vm5, %v1390_v36, %v1391_v35  ;;  %v2138_v61 = vsel %vm220_vm7, %v1381_v43, %v1385_v46  ;;  %v2163_v27 = vsel %vm220_vm7, %v1386_v2, %v1380_v56 }
  0xcd   :  { %v1401_v33 = vunpack.i.h.bf16 %v1399_v31  ;;  %v1400_v34 = vunpack.i.l.bf16 %v1399_v31  ;;  %v1395_v37 = vunpack.i.l.bf16 %v2114_v32  ;;  %v1396_v4 = vunpack.i.h.bf16 %v2114_v32 }
  0xcf   :  { %v284_v39 = vsel %vm282_vm4, %v1400_v34, %v1401_v33  ;;  %v254_v47 = vsel %vm251_vm5, %v1391_v35, %v1395_v37  ;;  %v252_v28 = vsel %vm251_vm5, %v1396_v4, %v1390_v36 }
  0xd0   :  { %v1409_v40 = vpop.permute.xlu1 %1408  ;;  %v1404_v41 = vpop.permute.xlu0 %1403  ;;  %v2126_v49 = vsel %vm545_vm2, %v253_v38, %v284_v39 }
  0xd1   :  { %v1405_v42 = vunpack.i.l.bf16 %v1404_v41  ;;  %v1411_v44 = vunpack.i.h.bf16 %v1409_v40  ;;  %v1410_v45 = vunpack.i.l.bf16 %v1409_v40  ;;  %v1406_v62 = vunpack.i.h.bf16 %v1404_v41 }
  0xd3   :  { %v285_v48 = vsel %vm282_vm4, %v1401_v33, %v1405_v42  ;;  %v623_v57 = vsel %vm621_vm6, %v1410_v45, %v1411_v44  ;;  %v283_v23 = vsel %vm282_vm4, %v1406_v62, %v1400_v34 }
  0xd4   :  { %v2128_v50 = vpop.permute.xlu1 %1418  ;;  %v1414_v51 = vpop.permute.xlu0 %1413  ;;  %v2131_v52 = vsel %vm545_vm2, %v254_v47, %v285_v48  ;;  %v644_v14 = vsel %vm545_vm2, %v623_v57, %v2142_v1  ;;  %v2185_v40 = vsel %vm545_vm2, %v252_v28, %v283_v23  ;;  %v1827_v57 = vmov 0.0  }
  0xd5   :  { %v1415_v55 = vunpack.i.l.bf16 %v1414_v51  ;;  %v1617_v60 = vpack.i.bf16 %v2131_v52, %v2126_v49  ;;  %v1421_v12 = vunpack.i.h.bf16 %v2128_v50  ;;  %v1416_v13 = vunpack.i.h.bf16 %v1414_v51  ;;  %928 = vmatprep.mubr.f32.mxu0 %v1827_v57  ;;  %999 = vmatprep.mubr.f32.mxu1 %v1827_v57 }
  0xd6   :  { %v1420_v21 = vunpack.i.l.bf16 %v2128_v50 }
  0xd7   :  { %v624_v63 = vsel %vm621_vm6, %v1411_v44, %v1415_v55  ;;  %1618 = vrot.lane.b32.xlu0 %v1617_v60, %s1826_s11  ;;  %v622_v33 = vsel %vm621_vm6, %v1416_v13, %v1410_v45 }
  0xd8   :  { %v2147_v5 = vpop.permute.xlu1 %1428  ;;  %v2149_v6 = vpop.permute.xlu0 %1423  ;;  %v645_v8 = vsel %vm545_vm2, %v624_v63, %v2138_v61  ;;  %v2172_v32 = vsel %vm220_vm7, %v1420_v21, %v1421_v12  ;;  %v2178_v38 = vsel %vm220_vm7, %v1385_v46, %v1420_v21  ;;  %v643_v47 = vsel %vm545_vm2, %v622_v33, %v2163_v27 }
  0xd9   :  { %v1431_v22 = vunpack.i.h.bf16 %v2147_v5  ;;  %v1430_v10 = vunpack.i.l.bf16 %v2147_v5  ;;  %v1612_v3 = vpack.i.bf16 %v645_v8, %v644_v14  ;;  %v1426_v24 = vunpack.i.h.bf16 %v2149_v6 }
  0xda   :  { %v1425_v25 = vunpack.i.l.bf16 %v2149_v6 }
  0xdb   :  { %1613 = vrot.lane.b32.xlu1 %v1612_v3, %s1826_s11  ;;  %v286_v36 = vsel %vm282_vm4, %v1405_v42, %v1430_v10  ;;  %v287_v39 = vsel %vm282_vm4, %v1430_v10, %v1431_v22 }
  0xdc   :  { %v300_v30 = vpop.permute.xlu1 %299  ;;  %v2167_v31 = vpop.permute.xlu0 %1433  ;;  %v255_v41 = vsel %vm251_vm5, %v1395_v37, %v1425_v25  ;;  %v256_v43 = vsel %vm251_vm5, %v1425_v25, %v1426_v24 }
  0xdd   :  { %v1436_v34 = vunpack.i.h.bf16 %v2167_v31  ;;  %v1435_v35 = vunpack.i.l.bf16 %v2167_v31  ;;  %v2207_v60 = vsel %vm545_vm2, %v255_v41, %v286_v36  ;;  %v2210_v62 = vsel %vm545_vm2, %v256_v43, %v287_v39 }
  0xde   :  { %v1632_v21 = vpack.i.bf16 %v2210_v62, %v2207_v60 }
  0xdf   :  { %v625_v44 = vsel %vm621_vm6, %v1415_v55, %v1435_v35  ;;  %v626_v45 = vsel %vm621_vm6, %v1435_v35, %v1436_v34 }
  0xe0   :  { %v304_v42 = vpop.permute.xlu1 %303  ;;  %v302_v46 = vpop.permute.xlu0 %301  ;;  %v646_v48 = vsel %vm545_vm2, %v625_v44, %v2178_v38  ;;  %v647_v37 = vsel %vm545_vm2, %v626_v45, %v2172_v32 }
  0xe1   :  { %v2202_v51 = vsel %vm313_vm8, %v300_v30, %v302_v46  ;;  %v1622_v56 = vpack.i.bf16 %v646_v48, %v643_v47  ;;  %v1627_v55 = vpack.i.bf16 %v2185_v40, %v647_v37  ;;  %v2216_v2 = vsel %vm313_vm8, %v302_v46, %v304_v42 }
  0xe2   :  { %v653_v63 = vsel %vm545_vm2, %v2202_v51, 1.0  ;;  %v654_v10 = vsel %vm545_vm2, %v2216_v2, 1.0 }
  0xe3   :  { %1623 = vrot.lane.b32.xlu1 %v1622_v56, %s1826_s11  ;;  %1628 = vrot.lane.b32.xlu0 %v1627_v55, %s1826_s11  ;;  %v662_v13 = vsel %vm660_vm9, %v653_v63, 0.0  ;;  %v663_v33 = vsel %vm660_vm9, %v654_v10, 0.0 }
  0xe4   :  { %v306_v4 = vpop.permute.xlu1 %305  ;;  %v298_v8 = vpop.permute.xlu0 %297 }
  0xe5   :  { %v2222_v14 = vsel %vm313_vm8, %v298_v8, %v300_v30  ;;  %v2233_v23 = vsel %vm313_vm8, %v304_v42, %v306_v4 }
  0xe6   :  { %v652_v3 = vsel %vm545_vm2, %v2222_v14, 1.0  ;;  %v655_v43 = vsel %vm545_vm2, %v2233_v23, 1.0 }
  0xe7   :  { %1633 = vrot.lane.b32.xlu1 %v1632_v21, %s1826_s11  ;;  %775 = vrot.lane.b32.xlu0 %v662_v13, %s1826_s11  ;;  %v661_v39 = vsel %vm660_vm9, %v652_v3, 0.0  ;;  %v664_v63 = vsel %vm660_vm9, %v655_v43, 0.0 }
  0xe8   :  { %v1439_v25 = vpop.permute.xlu1 %1438  ;;  %v2235_v28 = vpop.permute.xlu0 %307 }
  0xe9   :  { %v2239_v30 = vsel %vm313_vm8, %v306_v4, %v2235_v28  ;;  %v1441_v35 = vunpack.i.h.bf16 %v1439_v25  ;;  %v1440_v36 = vunpack.i.l.bf16 %v1439_v25 }
  0xea   :  { %v656_v41 = vsel %vm545_vm2, %v2239_v30, 1.0 }
  0xeb   :  { %777 = vrot.lane.b32.xlu1 %v663_v33, %s1826_s11  ;;  %773 = vrot.lane.b32.xlu0 %v661_v39, %s1826_s11  ;;  %v665_v42 = vsel %vm660_vm9, %v656_v41, 0.0  ;;  %v102_v56 = vsel %vm96_vm0, %v1366_v59, %v1440_v36  ;;  %v103_v55 = vsel %vm96_vm0, %v1440_v36, %v1441_v35  ;;  %vm499_vm0 = vcmask 687104  }
  0xec   :  { %v1449_v44 = vpop.permute.xlu1 %1448  ;;  %v1444_v45 = vpop.permute.xlu0 %1443  ;;  %v2277_v53 = vsel %vm545_vm2, %v1926_v11, %v102_v56 }
  0xed   :  { %v1451_v46 = vunpack.i.h.bf16 %v1449_v44  ;;  %v1450_v47 = vunpack.i.l.bf16 %v1449_v44  ;;  %v1446_v48 = vunpack.i.h.bf16 %v1444_v45  ;;  %v1445_v37 = vunpack.i.l.bf16 %v1444_v45 }
  0xee   :  { %v2308_v44 = vsel %vm545_vm2, %v1967_v16, %v1441_v35  ;;  %v1672_v35 = vpack.i.bf16 %v78_v17, %v1926_v11 }
  0xef   :  { %v164_v4 = vsel %vm158_vm3, %v1376_v9, %v1450_v47  ;;  %v165_v8 = vsel %vm158_vm3, %v1450_v47, %v1451_v46  ;;  %v133_v13 = vsel %vm127_vm1, %v1371_v58, %v1445_v37  ;;  %v134_v21 = vsel %vm127_vm1, %v1445_v37, %v1446_v48  ;;  %779 = vrot.lane.b32.xlu1 %v664_v63, %s1826_s11 }
  0xf0   :  { %781 = vrot.lane.b32.xlu0 %v665_v42, %s1826_s11  ;;  %v2265_v54 = vpop.permute.xlu1 %1458  ;;  %v2267_v59 = vpop.permute.xlu0 %1453  ;;  %v2270_v7 = vsel %vm545_vm2, %v133_v13, %v164_v4  ;;  %v2273_v9 = vsel %vm545_vm2, %v134_v21, %v165_v8  ;;  %v2281_v58 = vsel %vm545_vm2, %v1965_v15, %v103_v55  ;;  %v2311_v45 = vsel %vm545_vm2, %v1446_v48, %v1451_v46 }
  0xf1   :  { %v1682_v3 = vpack.i.bf16 %v2273_v9, %v2270_v7  ;;  %v1266_v25 = vpack.c.bf16 %v2270_v7, %v2277_v53  ;;  %v1461_v42 = vunpack.i.h.bf16 %v2265_v54  ;;  %v1460_v47 = vunpack.i.l.bf16 %v2265_v54 }
  0xf2   :  { %v1456_v37 = vunpack.i.h.bf16 %v2267_v59  ;;  %v1455_v55 = vunpack.i.l.bf16 %v2267_v59  ;;  %v1677_v13 = vpack.i.bf16 %v2281_v58, %v2277_v53  ;;  %v1687_v15 = vpack.i.bf16 %v2311_v45, %v2308_v44 }
  0xf3   :  { %1638 = vrot.lane.b32.xlu1 %v1986_v20, %s1818_s1  ;;  %vm530_vm1 = vcmask 556032   ;;  %vm789_vm3 = vcmask 547840  }
  0xf4   :  { %1643 = vrot.lane.b32.xlu0 %v1979_v19, %s1819_s4  ;;  %v2293_v33 = vpop.permute.xlu1 %1468  ;;  %v2295_v36 = vpop.permute.xlu0 %1463  ;;  %v2343_v10 = vsel %vm220_vm7, %v1455_v55, %v1456_v37  ;;  %v2351_v45 = vsel %vm220_vm7, %v1421_v12, %v1455_v55 }
  0xf5   :  { %v1470_v39 = vunpack.i.l.bf16 %v2293_v33  ;;  %v1471_v56 = vunpack.i.h.bf16 %v2293_v33  ;;  %v1465_v63 = vunpack.i.l.bf16 %v2295_v36  ;;  %v1466_v48 = vunpack.i.h.bf16 %v2295_v36 }
  0xf7   :  { %1648 = vrot.lane.b32.xlu1 %v1986_v20, %s1821_s6  ;;  %v627_v46 = vsel %vm621_vm6, %v1436_v34, %v1470_v39  ;;  %v257_v34 = vsel %vm251_vm5, %v1426_v24, %v1460_v47  ;;  %v628_v44 = vsel %vm621_vm6, %v1470_v39, %v1471_v56  ;;  %v288_v6 = vsel %vm282_vm4, %v1431_v22, %v1465_v63 }
  0xf8   :  { %1653 = vrot.lane.b32.xlu0 %v1979_v19, %s1820_s5  ;;  %v2302_v41 = vpop.permute.xlu1 %311  ;;  %v2304_v43 = vpop.permute.xlu0 %309  ;;  %v289_v39 = vsel %vm282_vm4, %v1465_v63, %v1466_v48  ;;  %v648_v55 = vsel %vm545_vm2, %v627_v46, %v2351_v45  ;;  %vm1829_vm4 = vmmov 0  }
  0xf9   :  { %v659_v59 = vsel %vm545_vm2, %v2302_v41, 1.0 }
  0xfb   :  { %1658 = vrot.lane.b32.xlu1 %v1986_v20, %s1822_s7 }
  0xfc   :  { %1663 = vrot.lane.b32.xlu0 %v1979_v19, %s1823_s8  ;;  %v1479_v4 = vpop.permute.xlu1 %1478  ;;  %v1474_v8 = vpop.permute.xlu0 %1473  ;;  %v258_v19 = vsel %vm251_vm5, %v1460_v47, %v1461_v42 }
  0xfd   :  { %v1481_v11 = vunpack.i.h.bf16 %v1479_v4  ;;  %v1480_v17 = vunpack.i.l.bf16 %v1479_v4  ;;  %v1476_v21 = vunpack.i.h.bf16 %v1474_v8  ;;  %v1475_v31 = vunpack.i.l.bf16 %v1474_v8 }
  0xff   :  { %v190_v24 = vsel %vm189_vm10, %v1480_v17, %v1475_v31  ;;  %v191_v47 = vsel %vm189_vm10, %v1475_v31, %v1476_v21  ;;  %1668 = vrot.lane.b32.xlu1 %v1986_v20, %s1824_s9  ;;  %v192_v20 = vsel %vm189_vm10, %v1476_v21, %v1481_v11  ;;  %v2391_v21 = vsel %vm545_vm2, %v257_v34, %v288_v6 }
 0x100   :  { %1673 = vrot.lane.b32.xlu0 %v1672_v35, %s1825_s10  ;;  %v2364_v50 = vpop.permute.xlu1 %1488  ;;  %v2366_v12 = vpop.permute.xlu0 %1483  ;;  %v561_v5 = vsel %vm545_vm2, %v191_v47, %v2142_v1  ;;  %v560_v22 = vsel %vm545_vm2, %v190_v24, %v2163_v27  ;;  %v649_v35 = vsel %vm545_vm2, %v628_v44, %v2343_v10  ;;  %v2394_v44 = vsel %vm545_vm2, %v258_v19, %v289_v39 }
 0x101   :  { %v1486_v4 = vunpack.i.h.bf16 %v2366_v12  ;;  %v1485_v63 = vunpack.i.l.bf16 %v2366_v12  ;;  %v1491_v8 = vunpack.i.h.bf16 %v2364_v50  ;;  %v1490_v17 = vunpack.i.l.bf16 %v2364_v50 }
 0x102   :  { %v1222_v1 = vpack.c.bf16 %v2126_v49, %v561_v5  ;;  %v1224_v27 = vpack.c.bf16 %v2185_v40, %v560_v22  ;;  %v562_v16 = vsel %vm545_vm2, %v192_v20, %v2138_v61  ;;  %v2412_v24 = vsel %vm313_vm8, %v2235_v28, %v2304_v43 }
 0x103   :  { %v193_v31 = vsel %vm189_vm10, %v1481_v11, %v1485_v63  ;;  %v194_v46 = vsel %vm189_vm10, %v1485_v63, %v1486_v4  ;;  %528 = vrot.lane.b32.xlu1 %v79_v18, %s1825_s10  ;;  %v346_v61 = vsel %vm344_vm11, %v1490_v17, %v1491_v8  ;;  %v2425_v47 = vsel %vm313_vm8, %v2304_v43, %v2302_v41 }
 0x104   :  { %1678 = vrot.lane.b32.xlu0 %v1677_v13, %s1826_s11  ;;  %1223 = vmatprep.subr.bf16.mxu0 %v1222_v1  ;;  %v2397_v49 = vpop.permute.xlu1 %1498  ;;  %v1494_v40 = vpop.permute.xlu0 %1493  ;;  %v563_v11 = vsel %vm545_vm2, %v193_v31, %v2178_v38  ;;  %v2405_v18 = vsel %vm545_vm2, %v194_v46, %v2172_v32  ;;  %v1692_v22 = vpack.i.bf16 %v649_v35, %v648_v55 }
 0x105   :  { %v1501_v34 = vunpack.i.h.bf16 %v2397_v49  ;;  %v1500_v19 = vunpack.i.l.bf16 %v2397_v49  ;;  %v1496_v13 = vunpack.i.h.bf16 %v1494_v40  ;;  %v1495_v6 = vunpack.i.l.bf16 %v1494_v40  ;;  %1225 = vmatpush1.bf16.msra.mxu0 %v1224_v27 }
 0x106   :  { %v1246_v32 = vpack.c.bf16 %v2207_v60, %v563_v11  ;;  %v1272_v38 = vpack.c.bf16 %v2210_v62, %v2405_v18  ;;  %v1248_v60 = vpack.c.bf16 %v2131_v52, %v562_v16  ;;  %v650_v63 = vsel %vm545_vm2, %v1471_v56, %v1456_v37 }
 0x107   :  { %v408_v28 = vsel %vm406_vm12, %v1500_v19, %v1501_v34  ;;  %v377_v39 = vsel %vm375_vm13, %v1495_v6, %v1496_v13  ;;  %1683 = vrot.lane.b32.xlu1 %v1682_v3, %s1826_s11  ;;  %v575_v52 = vsel %vm545_vm2, %v2202_v51, %v346_v61  ;;  %v1697_v33 = vpack.i.bf16 %v2394_v44, %v2391_v21 }
 0x108   :  { %1247 = vmatprep.subr.bf16.mxu1 %v1246_v32  ;;  %1688 = vrot.lane.b32.xlu0 %v1687_v15, %s1826_s11  ;;  %v2439_v43 = vpop.permute.xlu1 %1508  ;;  %v1504_v5 = vpop.permute.xlu0 %1503  ;;  %v582_v20 = vsel %vm545_vm2, %v377_v39, %v408_v28  ;;  %v651_v15 = vsel %vm545_vm2, %v1461_v42, %v1466_v48  ;;  %v657_v51 = vsel %vm545_vm2, %v2412_v24, 1.0  ;;  %v658_v42 = vsel %vm545_vm2, %v2425_v47, 1.0 }
 0x109   :  { %v1511_v1 = vunpack.i.h.bf16 %v2439_v43  ;;  %v1510_v3 = vunpack.i.l.bf16 %v2439_v43  ;;  %1249 = vmatpush1.bf16.msra.mxu1 %v1248_v60  ;;  %v1226_v37 = vpack.c.bf16 %v582_v20, %v575_v52  ;;  %v1506_v55 = vunpack.i.h.bf16 %v1504_v5 }
 0x10a   :  { %v1505_v35 = vunpack.i.l.bf16 %v1504_v5  ;;  %v1702_v41 = vpack.i.bf16 %v651_v15, %v650_v63  ;;  %v666_v40 = vsel %vm660_vm9, %v657_v51, 0.0  ;;  %v668_v11 = vsel %vm660_vm9, %v659_v59, 0.0 }
 0x10b   :  { %v349_v56 = vsel %vm344_vm11, %v1510_v3, %v1511_v1  ;;  %1693 = vrot.lane.b32.xlu1 %v1692_v22, %s1826_s11  ;;  %1227 = vmatprep.subr.bf16.mxu0 %v1226_v37  ;;  %v347_v61 = vsel %vm344_vm11, %v1491_v8, %v1506_v55  ;;  %v348_v32 = vsel %vm344_vm11, %v1506_v55, %v1510_v3  ;;  %v667_v50 = vsel %vm660_vm9, %v658_v42, 0.0 }
 0x10c   :  { %1698 = vrot.lane.b32.xlu0 %v1697_v33, %s1826_s11  ;;  %v2467_v54 = vpop.permute.xlu1 %1518  ;;  %v1514_v36 = vpop.permute.xlu0 %1513  ;;  %v2477_v16 = vsel %vm545_vm2, %v2239_v30, %v349_v56  ;;  %v345_v28 = vsel %vm344_vm11, %v1505_v35, %v1490_v17 }
 0x10d   :  { %v1521_v48 = vunpack.i.h.bf16 %v2467_v54  ;;  %v1520_v27 = vunpack.i.l.bf16 %v2467_v54  ;;  %v1516_v31 = vunpack.i.h.bf16 %v1514_v36  ;;  %v1515_v46 = vunpack.i.l.bf16 %v1514_v36 }
 0x10e   :  { %v574_v52 = vsel %vm545_vm2, %v2222_v14, %v345_v28 }
 0x10f   :  { %v380_v39 = vsel %vm375_vm13, %v1520_v27, %v1521_v48  ;;  %1703 = vrot.lane.b32.xlu1 %v1702_v41, %s1826_s11  ;;  %v379_v60 = vsel %vm375_vm13, %v1516_v31, %v1520_v27  ;;  %v376_v30 = vsel %vm375_vm13, %v1515_v46, %v1495_v6  ;;  %v378_v5 = vsel %vm375_vm13, %v1496_v13, %v1516_v31 }
 0x110   :  { %783 = vrot.lane.b32.xlu0 %v666_v40, %s1826_s11  ;;  %v2494_v8 = vpop.permute.xlu1 %1528  ;;  %v1524_v22 = vpop.permute.xlu0 %1523  ;;  %v577_v6 = vsel %vm545_vm2, %v2233_v23, %v348_v32  ;;  %v576_v13 = vsel %vm545_vm2, %v2216_v2, %v347_v61 }
 0x111   :  { %v1531_v17 = vunpack.i.h.bf16 %v2494_v8  ;;  %v1530_v20 = vunpack.i.l.bf16 %v2494_v8  ;;  %v1526_v63 = vunpack.i.h.bf16 %v1524_v22  ;;  %v1525_v3 = vunpack.i.l.bf16 %v1524_v22 }
 0x113   :  { %v411_v15 = vsel %vm406_vm12, %v1530_v20, %v1531_v17  ;;  %v409_v59 = vsel %vm406_vm12, %v1501_v34, %v1526_v63  ;;  %v410_v33 = vsel %vm406_vm12, %v1526_v63, %v1530_v20  ;;  %v407_v14 = vsel %vm406_vm12, %v1525_v3, %v1500_v19  ;;  %785 = vrot.lane.b32.xlu1 %v667_v50, %s1826_s11 }
 0x114   :  { %787 = vrot.lane.b32.xlu0 %v668_v11, %s1826_s11  ;;  %v581_v2 = vsel %vm545_vm2, %v376_v30, %v407_v14  ;;  %v584_v23 = vsel %vm545_vm2, %v379_v60, %v410_v33  ;;  %v583_v37 = vsel %vm545_vm2, %v378_v5, %v409_v59  ;;  %v1534_v56 = vpop.permute.xlu0 %1533  ;;  %v1539_v55 = vpop.permute.xlu1 %1538  ;;  %v2521_v34 = vsel %vm545_vm2, %v380_v39, %v411_v15 }
 0x115   :  { %v1228_v35 = vpack.c.bf16 %v581_v2, %v574_v52  ;;  %v1250_v51 = vpack.c.bf16 %v584_v23, %v577_v6  ;;  %v1252_v49 = vpack.c.bf16 %v583_v37, %v576_v13  ;;  %v1536_v36 = vunpack.i.h.bf16 %v1534_v56 }
 0x116   :  { %v1535_v19 = vunpack.i.l.bf16 %v1534_v56  ;;  %v1541_v41 = vunpack.i.h.bf16 %v1539_v55  ;;  %v1540_v42 = vunpack.i.l.bf16 %v1539_v55  ;;  %v1276_v27 = vpack.c.bf16 %v2521_v34, %v2477_v16 }
 0x117   :  { %1229 = vmatpush1.bf16.msra.mxu0 %v1228_v35  ;;  %1251 = vmatprep.subr.bf16.mxu1 %v1250_v51 }
 0x118   :  { %1253 = vmatpush1.bf16.msra.mxu1 %v1252_v49  ;;  %v439_v31 = vsel %vm437_vm14, %v1535_v19, %v1536_v36  ;;  %v470_v46 = vsel %vm468_vm15, %v1540_v42, %v1541_v41  ;;  %v1544_v40 = vpop.permute.xlu0 %1543  ;;  %v1549_v11 = vpop.permute.xlu1 %1548 }
 0x119   :  { %v1546_v61 = vunpack.i.h.bf16 %v1544_v40  ;;  %v1545_v32 = vunpack.i.l.bf16 %v1544_v40  ;;  %v1551_v28 = vunpack.i.h.bf16 %v1549_v11  ;;  %v1550_v39 = vunpack.i.l.bf16 %v1549_v11 }
 0x11a   :  { %v589_v5 = vsel %vm545_vm2, %v439_v31, %v470_v46 }
 0x11b   :  { %v501_v60 = vsel %vm499_vm0, %v1545_v32, %v1546_v61  ;;  %v532_v30 = vsel %vm530_vm1, %v1550_v39, %v1551_v28 }
 0x11c   :  { %v1554_v22 = vpop.permute.xlu0 %1553  ;;  %v2530_v50 = vpop.permute.xlu1 %1558  ;;  %v596_v20 = vsel %vm545_vm2, %v501_v60, %v532_v30 }
 0x11d   :  { %v1561_v63 = vunpack.i.h.bf16 %v2530_v50  ;;  %v1560_v3 = vunpack.i.l.bf16 %v2530_v50  ;;  %v1230_v52 = vpack.c.bf16 %v596_v20, %v589_v5  ;;  %v1556_v14 = vunpack.i.h.bf16 %v1554_v22 }
 0x11e   :  { %v1555_v2 = vunpack.i.l.bf16 %v1554_v22 }
 0x11f   :  { %v442_v6 = vsel %vm437_vm14, %v1560_v3, %v1561_v63  ;;  %1231 = vmatprep.subr.bf16.mxu0 %v1230_v52  ;;  %v440_v60 = vsel %vm437_vm14, %v1536_v36, %v1556_v14  ;;  %v441_v30 = vsel %vm437_vm14, %v1556_v14, %v1560_v3 }
 0x120   :  { %v1564_v13 = vpop.permute.xlu0 %1563  ;;  %v2538_v15 = vpop.permute.xlu1 %1568  ;;  %v438_v11 = vsel %vm437_vm14, %v1555_v2, %v1535_v19 }
 0x121   :  { %v1571_v59 = vunpack.i.h.bf16 %v2538_v15  ;;  %v1570_v33 = vunpack.i.l.bf16 %v2538_v15  ;;  %v1566_v23 = vunpack.i.h.bf16 %v1564_v13  ;;  %v1565_v37 = vunpack.i.l.bf16 %v1564_v13 }
 0x123   :  { %v473_v56 = vsel %vm468_vm15, %v1570_v33, %v1571_v59  ;;  %v471_v5 = vsel %vm468_vm15, %v1541_v41, %v1566_v23  ;;  %v469_v22 = vsel %vm468_vm15, %v1565_v37, %v1540_v42  ;;  %v472_v20 = vsel %vm468_vm15, %v1566_v23, %v1570_v33 }
 0x124   :  { %v1574_v55 = vpop.permute.xlu0 %1573  ;;  %v2545_v35 = vpop.permute.xlu1 %1578  ;;  %v2548_v51 = vsel %vm545_vm2, %v442_v6, %v473_v56  ;;  %v591_v42 = vsel %vm545_vm2, %v441_v30, %v472_v20  ;;  %v588_v33 = vsel %vm545_vm2, %v438_v11, %v469_v22  ;;  %v590_v14 = vsel %vm545_vm2, %v440_v60, %v471_v5 }
 0x125   :  { %v1576_v49 = vunpack.i.h.bf16 %v1574_v55  ;;  %v1575_v31 = vunpack.i.l.bf16 %v1574_v55  ;;  %v1581_v46 = vunpack.i.h.bf16 %v2545_v35  ;;  %v1580_v40 = vunpack.i.l.bf16 %v2545_v35 }
 0x127   :  { %v2561_v52 = vsel %vm499_vm0, %v1580_v40, %v1581_v46  ;;  %v500_v6 = vsel %vm499_vm0, %v1575_v31, %v1545_v32  ;;  %v502_v36 = vsel %vm499_vm0, %v1546_v61, %v1576_v49  ;;  %v503_v41 = vsel %vm499_vm0, %v1576_v49, %v1580_v40 }
 0x128   :  { %v1584_v13 = vpop.permute.xlu0 %1583  ;;  %v2564_v56 = vpop.permute.xlu1 %522 }
 0x129   :  { %v1586_v19 = vunpack.i.h.bf16 %v1584_v13  ;;  %v1585_v3 = vunpack.i.l.bf16 %v1584_v13 }
 0x12b   :  { %v533_v2 = vsel %vm530_vm1, %v1551_v28, %v1586_v19  ;;  %v531_v23 = vsel %vm530_vm1, %v1585_v3, %v1550_v39  ;;  %v534_v32 = vsel %vm530_vm1, %v1586_v19, %v2564_v56 }
 0x12c   :  { %v598_v37 = vsel %vm545_vm2, %v503_v41, %v534_v32  ;;  %v595_v61 = vsel %vm545_vm2, %v500_v6, %v531_v23  ;;  %v597_v55 = vsel %vm545_vm2, %v502_v36, %v533_v2 }
 0x12d   :  { %v1254_v49 = vpack.c.bf16 %v598_v37, %v591_v42  ;;  %v1232_v31 = vpack.c.bf16 %v595_v61, %v588_v33  ;;  %v1256_v40 = vpack.c.bf16 %v597_v55, %v590_v14 }
 0x12f   :  { %1255 = vmatprep.subr.bf16.mxu1 %v1254_v49  ;;  %1233 = vmatpush1.bf16.msra.mxu0 %v1232_v31 }
 0x130   :  { %1257 = vmatpush1.bf16.msra.mxu1 %v1256_v40 }
 0x132   :  { %v1589_v11 = vpop.permute.xlu0 %1588 }
 0x133   :  { %v1591_v60 = vunpack.i.h.bf16 %v1589_v11  ;;  %v1590_v28 = vunpack.i.l.bf16 %v1589_v11 }
 0x135   :  { %v1594_v30 = vpop.permute.xlu1 %1593  ;;  %v791_v22 = vsel %vm789_vm3, %v1590_v28, %v1591_v60 }
 0x136   :  { %v1596_v39 = vunpack.i.h.bf16 %v1594_v30  ;;  %v1595_v5 = vunpack.i.l.bf16 %v1594_v30 }
 0x138   :  { %v798_v20 = vsel %vm789_vm3, %v1595_v5, %v1596_v39 }
 0x139   :  { %v2580_v6 = vpop.permute.xlu1 %1603  ;;  %v1599_v13 = vpop.permute.xlu0 %1598  ;;  %v1234_v36 = vpack.c.bf16 %v798_v20, %v791_v22 }
 0x13a   :  { %v1606_v19 = vunpack.i.h.bf16 %v2580_v6  ;;  %v1600_v3 = vunpack.i.l.bf16 %v1599_v13  ;;  %v1605_v41 = vunpack.i.l.bf16 %v2580_v6  ;;  %v1601_v42 = vunpack.i.h.bf16 %v1599_v13 }
 0x13b   :  { %1235 = vmatprep.subr.bf16.mxu0 %v1234_v36 }
 0x13c   :  { %v790_v33 = vsel %vm789_vm3, %v1600_v3, %v1590_v28  ;;  %v797_v14 = vsel %vm789_vm3, %v1606_v19, %v1595_v5  ;;  %v793_v61 = vsel %vm789_vm3, %v1601_v42, %v1605_v41  ;;  %v792_v49 = vsel %vm789_vm3, %v1591_v60, %v1601_v42 }
 0x13d   :  { %v2586_v2 = vpop.permute.xlu0 %1608  ;;  %v1236_v23 = vpack.c.bf16 %v797_v14, %v790_v33 }
 0x13e   :  { %v1611_v32 = vunpack.i.h.bf16 %v2586_v2  ;;  %v1610_v37 = vunpack.i.l.bf16 %v2586_v2 }
 0x13f   :  { %1237 = vmatpush1.bf16.msra.mxu0 %v1236_v23 }
 0x140   :  { %v800_v55 = vsel %vm789_vm3, %v1610_v37, %v1611_v32  ;;  %v799_v31 = vsel %vm789_vm3, %v1596_v39, %v1610_v37 }
 0x141   :  { %v1258_v40 = vpack.c.bf16 %v800_v55, %v793_v61  ;;  %v1260_v11 = vpack.c.bf16 %v799_v31, %v792_v49 }
 0x143   :  { %1259 = vmatprep.subr.bf16.mxu1 %v1258_v40 }
 0x144   :  { %1261 = vmatpush1.bf16.msra.mxu1 %v1260_v11 }
 0x149   :  { %v1619_v28 = vpop.permute.xlu0 %1618 }
 0x14a   :  { %v1621_v30 = vunpack.i.h.bf16 %v1619_v28  ;;  %v1620_v5 = vunpack.i.l.bf16 %v1619_v28 }
 0x14c   :  { %v812_v19 = vsel %vm789_vm3, %v1620_v5, %v1621_v30 }
 0x14d   :  { %v1614_v22 = vpop.permute.xlu1 %1613 }
 0x14e   :  { %v1616_v20 = vunpack.i.h.bf16 %v1614_v22  ;;  %v1615_v13 = vunpack.i.l.bf16 %v1614_v22 }
 0x150   :  { %v805_v36 = vsel %vm789_vm3, %v1615_v13, %v1616_v20 }
 0x151   :  { %v1238_v3 = vpack.c.bf16 %v812_v19, %v805_v36 }
 0x153   :  { %1239 = vmatprep.subr.bf16.mxu0 %v1238_v3 }
 0x155   :  { %v1624_v33 = vpop.permute.xlu1 %1623  ;;  %v2600_v60 = vpop.permute.xlu0 %1628 }
 0x156   :  { %v1625_v39 = vunpack.i.l.bf16 %v1624_v33  ;;  %v1631_v42 = vunpack.i.h.bf16 %v2600_v60  ;;  %v1626_v14 = vunpack.i.h.bf16 %v1624_v33  ;;  %v1630_v23 = vunpack.i.l.bf16 %v2600_v60 }
 0x158   :  { %v804_v37 = vsel %vm789_vm3, %v1625_v39, %v1615_v13  ;;  %v811_v61 = vsel %vm789_vm3, %v1631_v42, %v1620_v5  ;;  %v807_v28 = vsel %vm789_vm3, %v1626_v14, %v1630_v23  ;;  %v806_v13 = vsel %vm789_vm3, %v1616_v20, %v1626_v14 }
 0x159   :  { %v2606_v55 = vpop.permute.xlu1 %1633  ;;  %v776_v49 = vpop.permute.xlu0 %775  ;;  %v1240_v31 = vpack.c.bf16 %v811_v61, %v804_v37  ;;  %v2620_v37 = vld [vmem:[#allocation7] sm:$0xff] }
 0x15a   :  { %v1636_v40 = vunpack.i.h.bf16 %v2606_v55  ;;  %v1635_v11 = vunpack.i.l.bf16 %v2606_v55 }
 0x15b   :  { %1241 = vmatpush1.bf16.msra.mxu0 %v1240_v31  ;;  %v1828_v31 = vmov 0.0|0.0  }
 0x15c   :  { %v814_v22 = vsel %vm789_vm3, %v1635_v11, %v1636_v40  ;;  %v813_v5 = vsel %vm789_vm3, %v1621_v30, %v1635_v11 }
 0x15d   :  { %v778_v36 = vpop.permute.xlu1 %777  ;;  %v774_v19 = vpop.permute.xlu0 %773  ;;  %v1262_v3 = vpack.c.bf16 %v814_v22, %v807_v28  ;;  %v1264_v33 = vpack.c.bf16 %v813_v5, %v806_v13 }
 0x15e   :  { %v819_v39 = vsel %vm789_vm3, %v776_v49, %v778_v36  ;;  %v818_v42 = vsel %vm789_vm3, %v774_v19, %v776_v49 }
 0x15f   :  { %888 = vmatprep.subr.mxu0 %v819_v39  ;;  %1263 = vmatprep.subr.bf16.mxu1 %v1262_v3 }
 0x160   :  { %889 = vmatpush1.msra.mxu0 %v818_v42  ;;  %1265 = vmatpush1.bf16.msra.mxu1 %v1264_v33 }
 0x161   :  { %v780_v61 = vpop.permute.xlu1 %779  ;;  %1267 = vmatprep.subr.bf16.mxu0 %v1266_v25  ;;  %1171 = vmatmul.mubr.msk.f32.vlgmr.msra.gmra.mrb[0].mxu0 %vm344_vm11, %v2620_v37 }
 0x162   :  { %v2627_v30 = vpop.permute.xlu0 %781  ;;  %1269 = vmatpush1.bf16.msra.mxu0 %v1268_v29  ;;  %v820_v20 = vsel %vm789_vm3, %v778_v36, %v780_v61  ;;  %1070 = vmatprep.mubr.f32.mxu0 %v1827_v57  ;;  %v2750_v29 = vpack.c.bf16 %v2273_v9, %v2281_v58 }
 0x163   :  { %v821_v14 = vsel %vm789_vm3, %v780_v61, %v2627_v30 }
 0x164   :  { %959 = vmatprep.subr.mxu1 %v821_v14 }
 0x165   :  { %960 = vmatpush1.msra.mxu1 %v820_v20  ;;  %v1639_v7 = vpop.permute.xlu1 %1638 }
 0x166   :  { %v1641_v53 = vunpack.i.h.bf16 %v1639_v7  ;;  %v1640_v25 = vunpack.i.l.bf16 %v1639_v7  ;;  %v1644_v49 = vpop.permute.xlu0 %1643  ;;  %1290 = vmatprep.subr.bf16.mxu1 %v1828_v31  ;;  %1172 = vmatmul.mubr.msk.f32.vlgmr.msra.gmra.mrb[0].mxu1 %vm344_vm11, %v2620_v37 }
 0x167   :  { %v1646_v0 = vunpack.i.h.bf16 %v1644_v49  ;;  %v1645_v26 = vunpack.i.l.bf16 %v1644_v49  ;;  %1292 = vmatpush3.bf16.msra.mxu1 %v2750_v29  ;;  %1215 = vmatprep.mubr.msk.f32.mxu1 %vm1829_vm4, %v1827_v57 }
 0x168   :  { %v195_v11 = vsel %vm189_vm10, %v1486_v4, %v1640_v25  ;;  %v196_v28 = vsel %vm189_vm10, %v1640_v25, %v1641_v53  ;;  %1293 = vmatprep.subr.bf16.mxu1 %v1828_v31 }
 0x169   :  { %v350_v22 = vsel %vm344_vm11, %v1511_v1, %v1645_v26  ;;  %v1649_v13 = vpop.permute.xlu1 %1648  ;;  %v565_v9 = vsel %vm545_vm2, %v195_v11, %v2351_v45  ;;  %v566_v58 = vsel %vm545_vm2, %v196_v28, %v2343_v10  ;;  %v351_v3 = vsel %vm344_vm11, %v1645_v26, %v1646_v0 }
 0x16a   :  { %v1651_v5 = vunpack.i.h.bf16 %v1649_v13  ;;  %v1650_v36 = vunpack.i.l.bf16 %v1649_v13  ;;  %v1654_v12 = vpop.permute.xlu0 %1653  ;;  %v1270_v4 = vpack.c.bf16 %v2391_v21, %v565_v9  ;;  %v1294_v19 = vpack.c.bf16 %v2394_v44, %v566_v58 }
 0x16b   :  { %v1656_v33 = vunpack.i.h.bf16 %v1654_v12  ;;  %v1655_v43 = vunpack.i.l.bf16 %v1654_v12  ;;  %v579_v44 = vsel %vm545_vm2, %v2412_v24, %v350_v22  ;;  %v580_v8 = vsel %vm545_vm2, %v2425_v47, %v351_v3 }
 0x16c   :  { %v381_v1 = vsel %vm375_vm13, %v1521_v48, %v1650_v36  ;;  %v382_v45 = vsel %vm375_vm13, %v1650_v36, %v1651_v5  ;;  %1271 = vmatprep.subr.bf16.mxu0 %v1270_v4  ;;  %1295 = vmatpush3.bf16.msra.mxu1 %v1294_v19 }
 0x16d   :  { %v412_v10 = vsel %vm406_vm12, %v1531_v17, %v1655_v43  ;;  %v413_v21 = vsel %vm406_vm12, %v1655_v43, %v1656_v33  ;;  %v1659_v39 = vpop.permute.xlu1 %1658  ;;  %1273 = vmatpush1.bf16.msra.mxu0 %v1272_v38  ;;  %1296 = vmatprep.subr.bf16.mxu1 %v1828_v31 }
 0x16e   :  { %v1660_v54 = vunpack.i.l.bf16 %v1659_v39  ;;  %v1664_v48 = vpop.permute.xlu0 %1663  ;;  %v586_v42 = vsel %vm545_vm2, %v381_v1, %v412_v10  ;;  %v587_v17 = vsel %vm545_vm2, %v382_v45, %v413_v21  ;;  %v1661_v7 = vunpack.i.h.bf16 %v1659_v39 }
 0x16f   :  { %v1665_v61 = vunpack.i.l.bf16 %v1664_v48  ;;  %v1274_v20 = vpack.c.bf16 %v586_v42, %v579_v44  ;;  %v1297_v14 = vpack.c.bf16 %v587_v17, %v580_v8  ;;  %v1666_v18 = vunpack.i.h.bf16 %v1664_v48 }
 0x170   :  { %v443_v62 = vsel %vm437_vm14, %v1561_v63, %v1660_v54  ;;  %v444_v15 = vsel %vm437_vm14, %v1660_v54, %v1661_v7 }
 0x171   :  { %v474_v24 = vsel %vm468_vm15, %v1571_v59, %v1665_v61  ;;  %1275 = vmatprep.subr.bf16.mxu0 %v1274_v20  ;;  %1298 = vmatpush3.bf16.msra.mxu1 %v1297_v14  ;;  %v1669_v38 = vpop.permute.xlu1 %1668  ;;  %v475_v59 = vsel %vm468_vm15, %v1665_v61, %v1666_v18 }
 0x172   :  { %v1671_v53 = vunpack.i.h.bf16 %v1669_v38  ;;  %v1670_v47 = vunpack.i.l.bf16 %v1669_v38  ;;  %v1674_v25 = vpop.permute.xlu0 %1673  ;;  %1277 = vmatpush1.bf16.msra.mxu0 %v1276_v27  ;;  %v593_v49 = vsel %vm545_vm2, %v443_v62, %v474_v24  ;;  %1299 = vmatprep.subr.bf16.mxu1 %v1828_v31  ;;  %v594_v35 = vsel %vm545_vm2, %v444_v15, %v475_v59 }
 0x173   :  { %v1676_v50 = vunpack.i.h.bf16 %v1674_v25  ;;  %v1675_v63 = vunpack.i.l.bf16 %v1674_v25 }
 0x174   :  { %v505_v0 = vsel %vm499_vm0, %v1581_v46, %v1670_v47  ;;  %v506_v27 = vsel %vm499_vm0, %v1670_v47, %v1671_v53 }
 0x175   :  { %v535_v26 = vsel %vm530_vm1, %v2564_v56, %v1675_v63  ;;  %v536_v16 = vsel %vm530_vm1, %v1675_v63, %v1676_v50  ;;  %v529_v34 = vpop.permute.xlu1 %528 }
 0x176   :  { %v537_v29 = vsel %vm530_vm1, %v1676_v50, %v529_v34  ;;  %v1679_v11 = vpop.permute.xlu0 %1678  ;;  %v600_v28 = vsel %vm545_vm2, %v505_v0, %v536_v16  ;;  %v599_v22 = vsel %vm545_vm2, %v2561_v52, %v535_v26 }
 0x177   :  { %v601_v46 = vsel %vm545_vm2, %v506_v27, %v537_v29  ;;  %v1278_v13 = vpack.c.bf16 %v600_v28, %v593_v49  ;;  %v1681_v56 = vunpack.i.h.bf16 %v1679_v11  ;;  %v1680_v58 = vunpack.i.l.bf16 %v1679_v11 }
 0x178   :  { %v1300_v9 = vpack.c.bf16 %v601_v46, %v594_v35  ;;  %v1280_v5 = vpack.c.bf16 %v599_v22, %v2548_v51 }
 0x179   :  { %1279 = vmatprep.subr.bf16.mxu0 %v1278_v13  ;;  %v1684_v36 = vpop.permute.xlu1 %1683  ;;  %v794_v52 = vsel %vm789_vm3, %v1605_v41, %v1680_v58  ;;  %v795_v51 = vsel %vm789_vm3, %v1680_v58, %v1681_v56 }
 0x17a   :  { %v1686_v12 = vunpack.i.h.bf16 %v1684_v36  ;;  %v1685_v4 = vunpack.i.l.bf16 %v1684_v36  ;;  %v1689_v19 = vpop.permute.xlu0 %1688  ;;  %1281 = vmatpush1.bf16.msra.mxu0 %v1280_v5  ;;  %1301 = vmatpush3.bf16.msra.mxu1 %v1300_v9 }
 0x17b   :  { %v1691_v3 = vunpack.i.h.bf16 %v1689_v19  ;;  %v1690_v33 = vunpack.i.l.bf16 %v1689_v19  ;;  %1302 = vmatprep.subr.bf16.mxu1 %v1828_v31 }
 0x17c   :  { %v801_v43 = vsel %vm789_vm3, %v1611_v32, %v1685_v4  ;;  %v802_v1 = vsel %vm789_vm3, %v1685_v4, %v1686_v12 }
 0x17d   :  { %v1284_v45 = vpack.c.bf16 %v801_v43, %v794_v52  ;;  %v803_v10 = vsel %vm789_vm3, %v1686_v12, %v1691_v3  ;;  %v796_v21 = vsel %vm789_vm3, %v1681_v56, %v1690_v33  ;;  %v1694_v39 = vpop.permute.xlu1 %1693  ;;  %v1282_v44 = vpack.c.bf16 %v802_v1, %v795_v51 }
 0x17e   :  { %v1303_v54 = vpack.c.bf16 %v803_v10, %v796_v21  ;;  %v1696_v48 = vunpack.i.h.bf16 %v1694_v39  ;;  %v1695_v6 = vunpack.i.l.bf16 %v1694_v39  ;;  %v1699_v42 = vpop.permute.xlu0 %1698 }
 0x17f   :  { %v1701_v41 = vunpack.i.h.bf16 %v1699_v42  ;;  %v1700_v8 = vunpack.i.l.bf16 %v1699_v42  ;;  %1283 = vmatprep.subr.bf16.mxu0 %v1282_v44 }
 0x180   :  { %v808_v2 = vsel %vm789_vm3, %v1630_v23, %v1695_v6  ;;  %1304 = vmatpush3.bf16.msra.mxu1 %v1303_v54  ;;  %1285 = vmatpush1.bf16.msra.mxu0 %v1284_v45  ;;  %v809_v32 = vsel %vm789_vm3, %v1695_v6, %v1696_v48 }
 0x181   :  { %v815_v17 = vsel %vm789_vm3, %v1636_v40, %v1700_v8  ;;  %v1704_v61 = vpop.permute.xlu1 %1703  ;;  %v816_v20 = vsel %vm789_vm3, %v1700_v8, %v1701_v41  ;;  %1305 = vmatprep.subr.bf16.mxu1 %v1828_v31 }
 0x182   :  { %v1288_v14 = vpack.c.bf16 %v815_v17, %v808_v2  ;;  %v1706_v7 = vunpack.i.h.bf16 %v1704_v61  ;;  %v1705_v62 = vunpack.i.l.bf16 %v1704_v61  ;;  %v784_v18 = vpop.permute.xlu0 %783  ;;  %v1286_v60 = vpack.c.bf16 %v816_v20, %v809_v32 }
 0x183   :  { %v822_v31 = vsel %vm789_vm3, %v2627_v30, %v784_v18 }
 0x184   :  { %v810_v23 = vsel %vm789_vm3, %v1696_v48, %v1705_v62  ;;  %v817_v24 = vsel %vm789_vm3, %v1701_v41, %v1706_v7  ;;  %1287 = vmatprep.subr.bf16.mxu0 %v1286_v60 }
 0x185   :  { %v1306_v38 = vpack.c.bf16 %v817_v24, %v810_v23  ;;  %1289 = vmatpush1.bf16.msra.mxu0 %v1288_v14  ;;  %v786_v55 = vpop.permute.xlu1 %785 }
 0x186   :  { %v823_v40 = vsel %vm789_vm3, %v784_v18, %v786_v55  ;;  %v788_v53 = vpop.permute.xlu0 %787 }
 0x187   :  { %1030 = vmatprep.subr.mxu0 %v823_v40  ;;  %1307 = vmatpush3.bf16.msra.mxu1 %v1306_v38  ;;  %v824_v47 = vsel %vm789_vm3, %v786_v55, %v788_v53 }
 0x188   :  { %1213 = vmatprep.subr.mxu1 %v1827_v57 }
 0x189   :  { %1031 = vmatpush1.msra.mxu0 %v822_v31 }
 0x18a   :  { %1173 = vmatmul.mubr.msk.f32.vlgmr.msra.gmra.mrb[2].mxu0 %vm344_vm11, %v2620_v37 }
 0x18b   :  { %1214 = vmatpush3.msra.mxu1 %v824_v47 }
 0x18c   :  { %1216 = vmatmul.mubr.msk.f32.vlgmr.msra.gmra.mrb[2].mxu1 %vm344_vm11, %v2620_v37 }
 0x234   :  { %v930_v25 = vpop.f32.mrb[0].mxu0 }
 0x235   :  { %1147 = vst [vmem:[#allocation8] sm:$0xff] %v930_v25  ;;  %v932_v49 = vpop.f32.mrb[1].mxu0 }
 0x236   :  { %1148 = vst [vmem:[#allocation8 + $0x8] sm:$0xff] %v932_v49 }
 0x239   :  { %v1001_v50 = vpop.f32.mrb[0].mxu1 }
 0x23a   :  { %1149 = vst [vmem:[#allocation8 + $0x10] sm:$0xff] %v1001_v50  ;;  %v1003_v63 = vpop.f32.mrb[1].mxu1 }
 0x23b   :  { %1150 = vst [vmem:[#allocation8 + $0x18] sm:$0xff] %v1003_v63 }
 0x25d   :  { %v1072_v57 = vpop.f32.mrb[2].mxu0 }
 0x25e   :  { %1151 = vst [vmem:[#allocation8 + $0x20] sm:$0xff] %v1072_v57  ;;  %v1074_v30 = vpop.f32.mrb[3].mxu0 }
 0x25f   :  { %1152 = vst [vmem:[#allocation8 + $0x28] sm:$0xff] %v1074_v30  ;;  %v1143_v15 = vpop.f32.mrb[2].mxu1 }
 0x260   :  { %1153 = vst [vmem:[#allocation8 + $0x30] sm:$0xff] %v1143_v15  ;;  %v1217_v59 = vpop.f32.mrb[3].mxu1 }
 0x261   :  { %1790 = shalt.err (!%p1787_p6)
}
 0x262   :  { %s1791_s17 = scalar_lea.hbm %s2749_s3, 896 }
 0x263   :  { %p1792_p7 = scmp.ne.s32.totalorder %s2749_s3, %s1791_s17  ;;  %p1795_p8 = scmp.lt.u32.totalorder %s1791_s17, %s2749_s3 }
 0x265   :  { %p1797_p9 = pnand %p1795_p8, %p1792_p7 }
 0x267   :  { %1800 = shalt.err (!%p1797_p9)
}
 0x268   :  { %1163 = dma.vmem_to_hbm [thread:$0]  %s1161_s13, 896, %s2749_s3, [#allocation4]  }
 0x269   :  { %1805 = dma.done.wait [#allocation4], 896  }
 0x26a   :  { %1806 = vsyncadd [#allocation4], 4294966400 }
 0x26b   :  { %1167 = vsyncpa [#allocation3], 1 }
 0x26c   :  { %1168 = vsyncpa [#allocation6], 1 }
 0x26d   :  { %1169 = vsyncpa [#allocation4], 1 }

</bundles_post_ra>
